<compile_context>
chip_gen: v7x
topology: tpu7x:2x2x1
jax: 0.10.0
libtpu: 0.0.40
codegen_flags: <defaults>
</compile_context>

<pallas_src>
import functools

import jax
import jax.numpy as jnp
from jax import lax
from jax.experimental import pallas as pl
from jax.experimental.pallas import tpu as pltpu

EPS = 1e-5
LANE = 128
_VMEM_LIMIT = 32 * 1024 * 1024   # fits v5e/v6e/v7x scoped-VMEM budgets


def _round_up(x, m):
    return (x + m - 1) // m * m


def _pick_tile(total, target, align=8):
    """Largest divisor of `total` that is <= target and a multiple of `align`.
    Falls back to `total` (a full-dim block is always legal)."""
    target = max(1, min(target, total))
    for cand in range(target, 0, -1):
        if total % cand == 0 and cand % align == 0:
            return cand
    return total


def _bn_fold(s_parts, ss_parts, gamma, beta, count):
    """Fold train-mode BN into per-channel scale/bias from partial sums."""
    c = s_parts.shape[-1]
    s = jnp.sum(s_parts.reshape(-1, c), axis=0)
    ss = jnp.sum(ss_parts.reshape(-1, c), axis=0)
    mean = s / count
    var = jnp.maximum(ss / count - mean * mean, 0.0)      # biased batch variance
    scale = gamma * lax.rsqrt(var + EPS)
    bias = beta - mean * scale
    return (scale.reshape(1, c).astype(jnp.float32),
            bias.reshape(1, c).astype(jnp.float32))


# --------------------------- kernels --------------------------------------- #

def _conv1x1_stats_kernel(x_ref, w_ref, y_ref, s_ref, ss_ref, *, cdt):
    # K1: 1x1 conv (row-tiled matmul) + partial BN stats of the pre-BN output.
    y = jnp.dot(x_ref[...].astype(cdt), w_ref[...],
                preferred_element_type=jnp.float32)
    y_ref[...] = y.astype(y_ref.dtype)
    s_ref[...] = jnp.sum(y, axis=0, keepdims=True).reshape(s_ref.shape)
    ss_ref[...] = jnp.sum(y * y, axis=0, keepdims=True).reshape(ss_ref.shape)


def _bn_relu_conv1x1_stats_kernel(x_ref, w_ref, sc_ref, bi_ref,
                                  y_ref, s_ref, ss_ref, *, cdt):
    # K3: folded-BN affine + ReLU + 1x1 conv + partial BN stats.
    a = jnp.maximum(x_ref[...].astype(jnp.float32) * sc_ref[...] + bi_ref[...], 0.0)
    y = jnp.dot(a.astype(cdt), w_ref[...], preferred_element_type=jnp.float32)
    y_ref[...] = y.astype(y_ref.dtype)
    s_ref[...] = jnp.sum(y, axis=0, keepdims=True).reshape(s_ref.shape)
    ss_ref[...] = jnp.sum(y * y, axis=0, keepdims=True).reshape(ss_ref.shape)


def _bn_relu_conv3x3_stats_kernel(y1_ref, w2_ref, sc_ref, bi_ref,
                                  y2_ref, s_ref, ss_ref, pad_ref):
    # K2: folded-BN1 + ReLU + 3x3 conv (stride 1, pad 1) + partial BN2 stats.
    #   y1_ref : (1, H+2, W, C)  whole H-zero-padded image, resident across th
    #   w2_ref : (3, 3, C, C)    HWIO weights, resident
    #   y2_ref : (1, TH, W, C)
    #   pad_ref: (TH+2, W+2, C)  VMEM scratch (W halo padded)
    _, TH, W, C = y2_ref.shape
    H = y1_ref.shape[1] - 2
    th = pl.program_id(1)

    start = pl.multiple_of(th * TH, TH)
    slab = y1_ref[0, pl.ds(start, TH + 2), :, :]                 # (TH+2, W, C)

    # BN1 affine + ReLU; zero the conv-padding rows (global rows 0 and H+1).
    a = jnp.maximum(slab.astype(jnp.float32) * sc_ref[...] + bi_ref[...], 0.0)
    row = th * TH + lax.broadcasted_iota(jnp.int32, (TH + 2, 1, 1), 0)
    a = jnp.where((row >= 1) & (row <= H), a, 0.0)

    # Stage into the W-padded scratch; only the 1-column halo is zeroed.
    pad_ref[:, 0:1, :] = jnp.zeros((TH + 2, 1, C), pad_ref.dtype)
    pad_ref[:, W + 1:W + 2, :] = jnp.zeros((TH + 2, 1, C), pad_ref.dtype)
    pad_ref[:, 1:W + 1, :] = a.astype(pad_ref.dtype)

    # 3x3 conv as 9 MXU matmuls: 3 W-shifted reads of the scratch; per-ky row
    # windows are cheap leading-dim slices of the flattened slab.
    acc = jnp.zeros((TH * W, C), jnp.float32)
    for kx in range(3):
        p = pad_ref[:, kx:kx + W, :].reshape((TH + 2) * W, C)
        for ky in range(3):
            lhs = p[ky * W:(ky + TH) * W, :]
            acc = acc + jnp.dot(lhs, w2_ref[ky, kx],
                                preferred_element_type=jnp.float32)

    y2_ref[...] = acc.reshape(y2_ref.shape).astype(y2_ref.dtype)
    s_ref[...] = jnp.sum(acc, axis=0, keepdims=True).reshape(s_ref.shape)
    ss_ref[...] = jnp.sum(acc * acc, axis=0, keepdims=True).reshape(ss_ref.shape)


def _bn_residual_relu_kernel(x_ref, y3_ref, sc_ref, bi_ref, o_ref):
    # K4: folded-BN3 + residual add (identity) + ReLU.  Output aliases x.
    y = y3_ref[...].astype(jnp.float32) * sc_ref[...] + bi_ref[...]
    o_ref[...] = jnp.maximum(y + x_ref[...], 0.0)


# --------------------------- wrapper ---------------------------------------- #

def bottleneck_forward(x_nchw, params, *, compute_dtype=jnp.float32,
                       row_tile=512, h_tile=8):
    """x_nchw: (N, Cin, H, W) float32 (PyTorch layout). Returns NCHW float32."""
    w1, g1, b1, w2, g2, b2, w3, g3, b3 = params
    cdt = jnp.dtype(compute_dtype)
    f32 = jnp.float32

    N, Cin, H, W = x_nchw.shape
    width = w1.shape[1]
    Cout = w3.shape[1]
    assert Cin == Cout, "downsample=None requires in_channel == out_channel*expansion"

    Cpi = _round_up(Cin, LANE)      # residual / conv1-in / conv3-out channels (padded)
    Cpw = _round_up(width, LANE)    # bottleneck width (padded)

    # NCHW -> NHWC, zero-pad channels to a lane-dense multiple of 128.
    x = jnp.transpose(x_nchw, (0, 2, 3, 1)).astype(f32)
    x = jnp.pad(x, ((0, 0), (0, 0), (0, 0), (0, Cpi - Cin)))
    M = N * H * W
    x_flat = x.reshape(M, Cpi)

    w1p = jnp.pad(w1, ((0, Cpi - Cin), (0, Cpw - width))).astype(cdt)
    w2p = jnp.pad(w2, ((0, 0), (0, 0), (0, Cpw - width), (0, Cpw - width))).astype(cdt)
    w3p = jnp.pad(w3, ((0, Cpw - width), (0, Cpi - Cout))).astype(cdt)
    g1p = jnp.pad(g1.astype(f32), (0, Cpw - width))
    b1p = jnp.pad(b1.astype(f32), (0, Cpw - width))
    g2p = jnp.pad(g2.astype(f32), (0, Cpw - width))
    b2p = jnp.pad(b2.astype(f32), (0, Cpw - width))
    g3p = jnp.pad(g3.astype(f32), (0, Cpi - Cout))
    b3p = jnp.pad(b3.astype(f32), (0, Cpi - Cout))

    TM = _pick_tile(M, row_tile, align=8)
    TH = _pick_tile(H, h_tile, align=1)
    n_row = M // TM
    n_th = H // TH
    count = float(M)

    params1 = pltpu.CompilerParams(dimension_semantics=("parallel",),
                                   vmem_limit_bytes=_VMEM_LIMIT)
    params2 = pltpu.CompilerParams(dimension_semantics=("parallel", "parallel"),
                                   vmem_limit_bytes=_VMEM_LIMIT)

    # ---- K1: conv1 (1x1) + BN1 partial stats --------------------------------
    y1_flat, s1, ss1 = pl.pallas_call(
        functools.partial(_conv1x1_stats_kernel, cdt=cdt),
        grid=(n_row,),
        in_specs=[pl.BlockSpec((TM, Cpi), lambda i: (i, 0)),
                  pl.BlockSpec((Cpi, Cpw), lambda i: (0, 0))],
        out_specs=[pl.BlockSpec((TM, Cpw), lambda i: (i, 0)),
                   pl.BlockSpec((1, 1, Cpw), lambda i: (i, 0, 0)),
                   pl.BlockSpec((1, 1, Cpw), lambda i: (i, 0, 0))],
        out_shape=[jax.ShapeDtypeStruct((M, Cpw), cdt),
                   jax.ShapeDtypeStruct((n_row, 1, Cpw), f32),
                   jax.ShapeDtypeStruct((n_row, 1, Cpw), f32)],
        compiler_params=params1,
    )(x_flat, w1p)
    scale1, bias1 = _bn_fold(s1, ss1, g1p, b1p, count)

    # ---- K2: BN1+ReLU + conv2 (3x3) + BN2 partial stats ----------------------
    # 1-row zero halo along H (conv padding); halo rows are masked in-kernel.
    y1_hp = jnp.pad(y1_flat.reshape(N, H, W, Cpw),
                    ((0, 0), (1, 1), (0, 0), (0, 0)))
    y2, s2, ss2 = pl.pallas_call(
        _bn_relu_conv3x3_stats_kernel,
        grid=(N, n_th),
        in_specs=[pl.BlockSpec((1, H + 2, W, Cpw), lambda n, t: (n, 0, 0, 0)),
                  pl.BlockSpec((3, 3, Cpw, Cpw), lambda n, t: (0, 0, 0, 0)),
                  pl.BlockSpec((1, Cpw), lambda n, t: (0, 0)),
                  pl.BlockSpec((1, Cpw), lambda n, t: (0, 0))],
        out_specs=[pl.BlockSpec((1, TH, W, Cpw), lambda n, t: (n, t, 0, 0)),
                   pl.BlockSpec((1, 1, 1, Cpw), lambda n, t: (n, t, 0, 0)),
                   pl.BlockSpec((1, 1, 1, Cpw), lambda n, t: (n, t, 0, 0))],
        out_shape=[jax.ShapeDtypeStruct((N, H, W, Cpw), cdt),
                   jax.ShapeDtypeStruct((N, n_th, 1, Cpw), f32),
                   jax.ShapeDtypeStruct((N, n_th, 1, Cpw), f32)],
        scratch_shapes=[pltpu.VMEM((TH + 2, W + 2, Cpw), cdt)],
        compiler_params=params2,
    )(y1_hp, w2p, scale1, bias1)
    scale2, bias2 = _bn_fold(s2, ss2, g2p, b2p, count)

    # ---- K3: BN2+ReLU + conv3 (1x1) + BN3 partial stats ----------------------
    y3_flat, s3, ss3 = pl.pallas_call(
        functools.partial(_bn_relu_conv1x1_stats_kernel, cdt=cdt),
        grid=(n_row,),
        in_specs=[pl.BlockSpec((TM, Cpw), lambda i: (i, 0)),
                  pl.BlockSpec((Cpw, Cpi), lambda i: (0, 0)),
                  pl.BlockSpec((1, Cpw), lambda i: (0, 0)),
                  pl.BlockSpec((1, Cpw), lambda i: (0, 0))],
        out_specs=[pl.BlockSpec((TM, Cpi), lambda i: (i, 0)),
                   pl.BlockSpec((1, 1, Cpi), lambda i: (i, 0, 0)),
                   pl.BlockSpec((1, 1, Cpi), lambda i: (i, 0, 0))],
        out_shape=[jax.ShapeDtypeStruct((M, Cpi), cdt),
                   jax.ShapeDtypeStruct((n_row, 1, Cpi), f32),
                   jax.ShapeDtypeStruct((n_row, 1, Cpi), f32)],
        compiler_params=params1,
    )(y2.reshape(M, Cpw), w3p, scale2, bias2)
    scale3, bias3 = _bn_fold(s3, ss3, g3p, b3p, count)

    # ---- K4: BN3 + residual add + ReLU (writes in place over x) --------------
    out_flat = pl.pallas_call(
        _bn_residual_relu_kernel,
        grid=(n_row,),
        in_specs=[pl.BlockSpec((TM, Cpi), lambda i: (i, 0)),
                  pl.BlockSpec((TM, Cpi), lambda i: (i, 0)),
                  pl.BlockSpec((1, Cpi), lambda i: (0, 0)),
                  pl.BlockSpec((1, Cpi), lambda i: (0, 0))],
        out_specs=pl.BlockSpec((TM, Cpi), lambda i: (i, 0)),
        out_shape=jax.ShapeDtypeStruct((M, Cpi), f32),
        input_output_aliases={0: 0},
        compiler_params=params1,
    )(x_flat, y3_flat, scale3, bias3)

    out = out_flat.reshape(N, H, W, Cpi)[..., :Cout]
    return jnp.transpose(out, (0, 3, 1, 2))      # NHWC -> NCHW


def ref_bottleneck(x_nchw, params):
    """Pure-JAX reference (same train-mode-BN math)."""
    w1, g1, b1, w2, g2, b2, w3, g3, b3 = params
    x = jnp.transpose(x_nchw, (0, 2, 3, 1))

    def bn(y, g, b):
        mean = y.mean(axis=(0, 1, 2), keepdims=True)
        var = ((y - mean) ** 2).mean(axis=(0, 1, 2), keepdims=True)
        return (y - mean) * lax.rsqrt(var + EPS) * g + b

    y1 = jnp.maximum(bn(jnp.einsum('nhwc,cd->nhwd', x, w1), g1, b1), 0.0)
    y2 = lax.conv_general_dilated(
        y1, w2, window_strides=(1, 1), padding=[(1, 1), (1, 1)],
        dimension_numbers=('NHWC', 'HWIO', 'NHWC'))
    y2 = jnp.maximum(bn(y2, g2, b2), 0.0)
    y3 = bn(jnp.einsum('nhwc,cd->nhwd', y2, w3), g3, b3)
    out = jnp.maximum(y3 + x, 0.0)
    return jnp.transpose(out, (0, 3, 1, 2))


if __name__ == "__main__":
    # Small Bottleneck config: out_channel=4, expansion=4 -> in_channel=16,
    # width=4, stride=1, downsample=None.
    N, H, W = 2, 8, 8
    out_channel = 4
    in_channel = out_channel * 4          # 16 (identity add requires Cin == Cout*4)
    width = out_channel                   # width_per_group=64, groups=1
    c_out = out_channel * 4               # 16

    key = jax.random.PRNGKey(0)
    ks = jax.random.split(key, 8)
    x = jax.random.normal(ks[0], (N, in_channel, H, W), jnp.float32)

    # conv weights stored directly in matmul / HWIO layout
    w1 = jax.random.normal(ks[1], (in_channel, width), jnp.float32) * 0.1   # 1x1
    w2 = jax.random.normal(ks[2], (3, 3, width, width), jnp.float32) * 0.1  # 3x3 HWIO
    w3 = jax.random.normal(ks[3], (width, c_out), jnp.float32) * 0.1        # 1x1

    g1 = jax.random.uniform(ks[4], (width,), jnp.float32, 0.5, 1.5)
    b1 = jax.random.normal(ks[5], (width,), jnp.float32) * 0.1
    g2 = jax.random.uniform(ks[6], (width,), jnp.float32, 0.5, 1.5)
    b2 = jax.random.normal(ks[7], (width,), jnp.float32) * 0.1
    g3 = jnp.ones((c_out,), jnp.float32)
    b3 = jnp.zeros((c_out,), jnp.float32)
    params = (w1, g1, b1, w2, g2, b2, w3, g3, b3)

    fwd = jax.jit(bottleneck_forward,
                  static_argnames=("compute_dtype", "row_tile", "h_tile"))

    # f32 path (faithful to the PyTorch module); small tiles to exercise the grid.
    out = jax.block_until_ready(
        fwd(x, params, compute_dtype=jnp.float32, row_tile=32, h_tile=4))
    ref = ref_bottleneck(x, params)
    assert out.shape == (N, c_out, H, W), out.shape
    assert jnp.allclose(out, ref, rtol=1e-4, atol=1e-4), \
        float(jnp.max(jnp.abs(out - ref)))

    # bf16-MXU / bf16-staging path (v6e/v7x): loose sanity check vs the f32 ref.
    out_bf16 = jax.block_until_ready(
        fwd(x, params, compute_dtype=jnp.bfloat16, row_tile=32, h_tile=4))
    assert out_bf16.shape == (N, c_out, H, W), out_bf16.shape
    assert jnp.allclose(out_bf16, ref, rtol=0.15, atol=0.15), \
        float(jnp.max(jnp.abs(out_bf16 - ref)))

    print("KERNEL_OK")
</pallas_src>

<mosaic_0001>
module attributes {stable_mosaic.version = 11 : i64} {
  func.func @_conv1x1_stats_kernel(%arg0: i32, %arg1: memref<32x128xf32, #tpu.memory_space<vmem>>, %arg2: memref<128x128xf32, #tpu.memory_space<vmem>>, %arg3: memref<32x128xf32, #tpu.memory_space<vmem>>, %arg4: memref<1x1x128xf32, #tpu.memory_space<vmem>>, %arg5: memref<1x1x128xf32, #tpu.memory_space<vmem>>) attributes {dimension_semantics = [#tpu.dimension_semantics<parallel>], iteration_bounds = array<i64: 4>, scalar_prefetch = 0 : i64, scratch_operands = 0 : i64, tpu.core_type = #tpu.core_type<tc>, window_params = [{transform_indices = @transform_0, window_bounds = array<i64: 32, 128>}, {pipeline_mode = #tpu.pipeline_mode<synchronous>, transform_indices = @transform_1, window_bounds = array<i64: 128, 128>}, {transform_indices = @transform_2, window_bounds = array<i64: 32, 128>}, {transform_indices = @transform_3, window_bounds = array<i64: 1, 1, 128>}, {transform_indices = @transform_4, window_bounds = array<i64: 1, 1, 128>}]} {
    %c0 = arith.constant 0 : index
    %c0_0 = arith.constant 0 : index
    %0 = vector.load %arg1[%c0, %c0_0] : memref<32x128xf32, #tpu.memory_space<vmem>>, vector<32x128xf32>
    %c0_1 = arith.constant 0 : index
    %c0_2 = arith.constant 0 : index
    %1 = vector.load %arg2[%c0_1, %c0_2] : memref<128x128xf32, #tpu.memory_space<vmem>>, vector<128x128xf32>
    %cst = arith.constant dense<0.000000e+00> : vector<32x128xf32>
    %2 = tpu.matmul %0, %1, %cst {dimension_numbers = #tpu.dot_dimension_numbers<[1], [0], [0], [1], [0, 0, 1, 1], [], []>} : vector<32x128xf32>, vector<128x128xf32>, vector<32x128xf32> -> vector<32x128xf32>
    %c0_3 = arith.constant 0 : index
    %c0_4 = arith.constant 0 : index
    %3 = vector.load %arg3[%c0_3, %c0_4] : memref<32x128xf32, #tpu.memory_space<vmem>>, vector<32x128xf32>
    tpu.vector_store %arg3[%c0_3, %c0_4], %2 {strides = array<i32>} : memref<32x128xf32, #tpu.memory_space<vmem>>, vector<32x128xf32>,
    %cst_5 = arith.constant dense<0.000000e+00> : vector<128xf32>
    %4 = vector.multi_reduction <add>, %2, %cst_5 [0] : vector<32x128xf32> to vector<128xf32>
    %5 = vector.shape_cast %4 : vector<128xf32> to vector<1x128xf32>
    %6 = vector.shape_cast %5 : vector<1x128xf32> to vector<1x1x128xf32>
    %c0_6 = arith.constant 0 : index
    %c0_7 = arith.constant 0 : index
    %c0_8 = arith.constant 0 : index
    %7 = vector.load %arg4[%c0_6, %c0_7, %c0_8] : memref<1x1x128xf32, #tpu.memory_space<vmem>>, vector<1x1x128xf32>
    tpu.vector_store %arg4[%c0_6, %c0_7, %c0_8], %6 {strides = array<i32>} : memref<1x1x128xf32, #tpu.memory_space<vmem>>, vector<1x1x128xf32>,
    %8 = arith.mulf %2, %2 : vector<32x128xf32>
    %cst_9 = arith.constant dense<0.000000e+00> : vector<128xf32>
    %9 = vector.multi_reduction <add>, %8, %cst_9 [0] : vector<32x128xf32> to vector<128xf32>
    %10 = vector.shape_cast %9 : vector<128xf32> to vector<1x128xf32>
    %11 = vector.shape_cast %10 : vector<1x128xf32> to vector<1x1x128xf32>
    %c0_10 = arith.constant 0 : index
    %c0_11 = arith.constant 0 : index
    %c0_12 = arith.constant 0 : index
    %12 = vector.load %arg5[%c0_10, %c0_11, %c0_12] : memref<1x1x128xf32, #tpu.memory_space<vmem>>, vector<1x1x128xf32>
    tpu.vector_store %arg5[%c0_10, %c0_11, %c0_12], %11 {strides = array<i32>} : memref<1x1x128xf32, #tpu.memory_space<vmem>>, vector<1x1x128xf32>,
    return
  }
  func.func @transform_0(%arg0: i32) -> (i32, i32) {
    %c0_i32 = arith.constant 0 : i32
    %c0_i32_0 = arith.constant 0 : i32
    return %arg0, %c0_i32 : i32, i32
  }
  func.func @transform_1(%arg0: i32) -> (i32, i32) {
    %c0_i32 = arith.constant 0 : i32
    %c0_i32_0 = arith.constant 0 : i32
    %c0_i32_1 = arith.constant 0 : i32
    return %c0_i32, %c0_i32_0 : i32, i32
  }
  func.func @transform_2(%arg0: i32) -> (i32, i32) {
    %c0_i32 = arith.constant 0 : i32
    %c0_i32_0 = arith.constant 0 : i32
    return %arg0, %c0_i32 : i32, i32
  }
  func.func @transform_3(%arg0: i32) -> (i32, i32, i32) {
    %c0_i32 = arith.constant 0 : i32
    %c0_i32_0 = arith.constant 0 : i32
    %c0_i32_1 = arith.constant 0 : i32
    return %arg0, %c0_i32, %c0_i32_0 : i32, i32, i32
  }
  func.func @transform_4(%arg0: i32) -> (i32, i32, i32) {
    %c0_i32 = arith.constant 0 : i32
    %c0_i32_0 = arith.constant 0 : i32
    %c0_i32_1 = arith.constant 0 : i32
    return %arg0, %c0_i32, %c0_i32_0 : i32, i32, i32
  }
}

module attributes {stable_mosaic.version = 11 : i64} {
  func.func @_bn_relu_conv1x1_stats_kernel(%arg0: i32, %arg1: memref<32x128xf32, #tpu.memory_space<vmem>>, %arg2: memref<128x128xf32, #tpu.memory_space<vmem>>, %arg3: memref<1x128xf32, #tpu.memory_space<vmem>>, %arg4: memref<1x128xf32, #tpu.memory_space<vmem>>, %arg5: memref<32x128xf32, #tpu.memory_space<vmem>>, %arg6: memref<1x1x128xf32, #tpu.memory_space<vmem>>, %arg7: memref<1x1x128xf32, #tpu.memory_space<vmem>>) attributes {dimension_semantics = [#tpu.dimension_semantics<parallel>], iteration_bounds = array<i64: 4>, scalar_prefetch = 0 : i64, scratch_operands = 0 : i64, tpu.core_type = #tpu.core_type<tc>, window_params = [{transform_indices = @transform_0, window_bounds = array<i64: 32, 128>}, {pipeline_mode = #tpu.pipeline_mode<synchronous>, transform_indices = @transform_1, window_bounds = array<i64: 128, 128>}, {pipeline_mode = #tpu.pipeline_mode<synchronous>, transform_indices = @transform_2, window_bounds = array<i64: 1, 128>}, {pipeline_mode = #tpu.pipeline_mode<synchronous>, transform_indices = @transform_3, window_bounds = array<i64: 1, 128>}, {transform_indices = @transform_4, window_bounds = array<i64: 32, 128>}, {transform_indices = @transform_5, window_bounds = array<i64: 1, 1, 128>}, {transform_indices = @transform_6, window_bounds = array<i64: 1, 1, 128>}]} {
    %c0 = arith.constant 0 : index
    %c0_0 = arith.constant 0 : index
    %0 = vector.load %arg1[%c0, %c0_0] : memref<32x128xf32, #tpu.memory_space<vmem>>, vector<32x128xf32>
    %c0_1 = arith.constant 0 : index
    %c0_2 = arith.constant 0 : index
    %1 = vector.load %arg3[%c0_1, %c0_2] : memref<1x128xf32, #tpu.memory_space<vmem>>, vector<1x128xf32>
    %2 = vector.broadcast %1 : vector<1x128xf32> to vector<32x128xf32>
    %3 = arith.mulf %0, %2 : vector<32x128xf32>
    %c0_3 = arith.constant 0 : index
    %c0_4 = arith.constant 0 : index
    %4 = vector.load %arg4[%c0_3, %c0_4] : memref<1x128xf32, #tpu.memory_space<vmem>>, vector<1x128xf32>
    %5 = vector.broadcast %4 : vector<1x128xf32> to vector<32x128xf32>
    %6 = arith.addf %3, %5 : vector<32x128xf32>
    %cst = arith.constant 0.000000e+00 : f32
    %7 = vector.broadcast %cst : f32 to vector<32x128xf32>
    %8 = arith.maximumf %6, %7 : vector<32x128xf32>
    %c0_5 = arith.constant 0 : index
    %c0_6 = arith.constant 0 : index
    %9 = vector.load %arg2[%c0_5, %c0_6] : memref<128x128xf32, #tpu.memory_space<vmem>>, vector<128x128xf32>
    %cst_7 = arith.constant dense<0.000000e+00> : vector<32x128xf32>
    %10 = tpu.matmul %8, %9, %cst_7 {dimension_numbers = #tpu.dot_dimension_numbers<[1], [0], [0], [1], [0, 0, 1, 1], [], []>} : vector<32x128xf32>, vector<128x128xf32>, vector<32x128xf32> -> vector<32x128xf32>
    %c0_8 = arith.constant 0 : index
    %c0_9 = arith.constant 0 : index
    %11 = vector.load %arg5[%c0_8, %c0_9] : memref<32x128xf32, #tpu.memory_space<vmem>>, vector<32x128xf32>
    tpu.vector_store %arg5[%c0_8, %c0_9], %10 {strides = array<i32>} : memref<32x128xf32, #tpu.memory_space<vmem>>, vector<32x128xf32>,
    %cst_10 = arith.constant dense<0.000000e+00> : vector<128xf32>
    %12 = vector.multi_reduction <add>, %10, %cst_10 [0] : vector<32x128xf32> to vector<128xf32>
    %13 = vector.shape_cast %12 : vector<128xf32> to vector<1x128xf32>
    %14 = vector.shape_cast %13 : vector<1x128xf32> to vector<1x1x128xf32>
    %c0_11 = arith.constant 0 : index
    %c0_12 = arith.constant 0 : index
    %c0_13 = arith.constant 0 : index
    %15 = vector.load %arg6[%c0_11, %c0_12, %c0_13] : memref<1x1x128xf32, #tpu.memory_space<vmem>>, vector<1x1x128xf32>
    tpu.vector_store %arg6[%c0_11, %c0_12, %c0_13], %14 {strides = array<i32>} : memref<1x1x128xf32, #tpu.memory_space<vmem>>, vector<1x1x128xf32>,
    %16 = arith.mulf %10, %10 : vector<32x128xf32>
    %cst_14 = arith.constant dense<0.000000e+00> : vector<128xf32>
    %17 = vector.multi_reduction <add>, %16, %cst_14 [0] : vector<32x128xf32> to vector<128xf32>
    %18 = vector.shape_cast %17 : vector<128xf32> to vector<1x128xf32>
    %19 = vector.shape_cast %18 : vector<1x128xf32> to vector<1x1x128xf32>
    %c0_15 = arith.constant 0 : index
    %c0_16 = arith.constant 0 : index
    %c0_17 = arith.constant 0 : index
    %20 = vector.load %arg7[%c0_15, %c0_16, %c0_17] : memref<1x1x128xf32, #tpu.memory_space<vmem>>, vector<1x1x128xf32>
    tpu.vector_store %arg7[%c0_15, %c0_16, %c0_17], %19 {strides = array<i32>} : memref<1x1x128xf32, #tpu.memory_space<vmem>>, vector<1x1x128xf32>,
    return
  }
  func.func @transform_0(%arg0: i32) -> (i32, i32) {
    %c0_i32 = arith.constant 0 : i32
    %c0_i32_0 = arith.constant 0 : i32
    return %arg0, %c0_i32 : i32, i32
  }
  func.func @transform_1(%arg0: i32) -> (i32, i32) {
    %c0_i32 = arith.constant 0 : i32
    %c0_i32_0 = arith.constant 0 : i32
    %c0_i32_1 = arith.constant 0 : i32
    return %c0_i32, %c0_i32_0 : i32, i32
  }
  func.func @transform_2(%arg0: i32) -> (i32, i32) {
    %c0_i32 = arith.constant 0 : i32
    %c0_i32_0 = arith.constant 0 : i32
    %c0_i32_1 = arith.constant 0 : i32
    return %c0_i32, %c0_i32_0 : i32, i32
  }
  func.func @transform_3(%arg0: i32) -> (i32, i32) {
    %c0_i32 = arith.constant 0 : i32
    %c0_i32_0 = arith.constant 0 : i32
    %c0_i32_1 = arith.constant 0 : i32
    return %c0_i32, %c0_i32_0 : i32, i32
  }
  func.func @transform_4(%arg0: i32) -> (i32, i32) {
    %c0_i32 = arith.constant 0 : i32
    %c0_i32_0 = arith.constant 0 : i32
    return %arg0, %c0_i32 : i32, i32
  }
  func.func @transform_5(%arg0: i32) -> (i32, i32, i32) {
    %c0_i32 = arith.constant 0 : i32
    %c0_i32_0 = arith.constant 0 : i32
    %c0_i32_1 = arith.constant 0 : i32
    return %arg0, %c0_i32, %c0_i32_0 : i32, i32, i32
  }
  func.func @transform_6(%arg0: i32) -> (i32, i32, i32) {
    %c0_i32 = arith.constant 0 : i32
    %c0_i32_0 = arith.constant 0 : i32
    %c0_i32_1 = arith.constant 0 : i32
    return %arg0, %c0_i32, %c0_i32_0 : i32, i32, i32
  }
}

module attributes {stable_mosaic.version = 11 : i64} {
  func.func @_bn_relu_conv3x3_stats_kernel(%arg0: i32, %arg1: i32, %arg2: memref<1x10x8x128xf32, #tpu.memory_space<vmem>>, %arg3: memref<3x3x128x128xf32, #tpu.memory_space<vmem>>, %arg4: memref<1x128xf32, #tpu.memory_space<vmem>>, %arg5: memref<1x128xf32, #tpu.memory_space<vmem>>, %arg6: memref<1x4x8x128xf32, #tpu.memory_space<vmem>>, %arg7: memref<1x1x1x128xf32, #tpu.memory_space<vmem>>, %arg8: memref<1x1x1x128xf32, #tpu.memory_space<vmem>>, %arg9: memref<6x10x128xf32, #tpu.memory_space<vmem>>) attributes {dimension_semantics = [#tpu.dimension_semantics<parallel>, #tpu.dimension_semantics<parallel>], iteration_bounds = array<i64: 2, 2>, scalar_prefetch = 0 : i64, scratch_operands = 1 : i64, tpu.core_type = #tpu.core_type<tc>, window_params = [{transform_indices = @transform_0, window_bounds = array<i64: 1, 10, 8, 128>}, {pipeline_mode = #tpu.pipeline_mode<synchronous>, transform_indices = @transform_1, window_bounds = array<i64: 3, 3, 128, 128>}, {pipeline_mode = #tpu.pipeline_mode<synchronous>, transform_indices = @transform_2, window_bounds = array<i64: 1, 128>}, {pipeline_mode = #tpu.pipeline_mode<synchronous>, transform_indices = @transform_3, window_bounds = array<i64: 1, 128>}, {transform_indices = @transform_4, window_bounds = array<i64: 1, 4, 8, 128>}, {transform_indices = @transform_5, window_bounds = array<i64: 1, 1, 1, 128>}, {transform_indices = @transform_6, window_bounds = array<i64: 1, 1, 1, 128>}]} {
    %c4_i32 = arith.constant 4 : i32
    %0 = arith.muli %arg1, %c4_i32 : i32
    %1 = tpu.assume_multiple %0, 4 : i32
    %c0 = arith.constant 0 : index
    %2 = arith.index_cast %1 : i32 to index
    %c0_0 = arith.constant 0 : index
    %c0_1 = arith.constant 0 : index
    %3 = vector.load %arg2[%c0, %2, %c0_0, %c0_1] : memref<1x10x8x128xf32, #tpu.memory_space<vmem>>, vector<1x6x8x128xf32>
    %4 = vector.shape_cast %3 : vector<1x6x8x128xf32> to vector<6x8x128xf32>
    %c0_2 = arith.constant 0 : index
    %c0_3 = arith.constant 0 : index
    %5 = vector.load %arg4[%c0_2, %c0_3] : memref<1x128xf32, #tpu.memory_space<vmem>>, vector<1x128xf32>
    %6 = vector.shape_cast %5 : vector<1x128xf32> to vector<1x1x128xf32>
    %7 = vector.broadcast %6 : vector<1x1x128xf32> to vector<6x8x128xf32>
    %8 = arith.mulf %4, %7 : vector<6x8x128xf32>
    %c0_4 = arith.constant 0 : index
    %c0_5 = arith.constant 0 : index
    %9 = vector.load %arg5[%c0_4, %c0_5] : memref<1x128xf32, #tpu.memory_space<vmem>>, vector<1x128xf32>
    %10 = vector.shape_cast %9 : vector<1x128xf32> to vector<1x1x128xf32>
    %11 = vector.broadcast %10 : vector<1x1x128xf32> to vector<6x8x128xf32>
    %12 = arith.addf %8, %11 : vector<6x8x128xf32>
    %cst = arith.constant 0.000000e+00 : f32
    %13 = vector.broadcast %cst : f32 to vector<6x8x128xf32>
    %14 = arith.maximumf %12, %13 : vector<6x8x128xf32>
    %c4_i32_6 = arith.constant 4 : i32
    %15 = arith.muli %arg1, %c4_i32_6 : i32
    %16 = tpu.iota {dimensions = array<i32: 0>} : vector<6x1x1xi32>
    %17 = vector.broadcast %15 : i32 to vector<6x1x1xi32>
    %18 = arith.addi %17, %16 : vector<6x1x1xi32>
    %c1_i32 = arith.constant 1 : i32
    %19 = vector.broadcast %c1_i32 : i32 to vector<6x1x1xi32>
    %20 = arith.cmpi sge, %18, %19 : vector<6x1x1xi32>
    %c8_i32 = arith.constant 8 : i32
    %21 = vector.broadcast %c8_i32 : i32 to vector<6x1x1xi32>
    %22 = arith.cmpi sle, %18, %21 : vector<6x1x1xi32>
    %23 = arith.andi %20, %22 : vector<6x1x1xi1>
    %cst_7 = arith.constant 0.000000e+00 : f32
    %24 = vector.shape_cast %23 : vector<6x1x1xi1> to vector<6x1x1xi1>
    %25 = vector.broadcast %24 : vector<6x1x1xi1> to vector<6x8x128xi1>
    %26 = vector.broadcast %cst_7 : f32 to vector<6x8x128xf32>
    %27 = arith.select %25, %14, %26 : vector<6x8x128xi1>, vector<6x8x128xf32>
    %cst_8 = arith.constant 0.000000e+00 : f32
    %28 = vector.broadcast %cst_8 : f32 to vector<6x1x128xf32>
    %c0_9 = arith.constant 0 : index
    %c0_10 = arith.constant 0 : index
    %c0_11 = arith.constant 0 : index
    %29 = vector.load %arg9[%c0_9, %c0_10, %c0_11] : memref<6x10x128xf32, #tpu.memory_space<vmem>>, vector<6x1x128xf32>
    tpu.vector_store %arg9[%c0_9, %c0_10, %c0_11], %28 {strides = array<i32>} : memref<6x10x128xf32, #tpu.memory_space<vmem>>, vector<6x1x128xf32>,
    %cst_12 = arith.constant 0.000000e+00 : f32
    %30 = vector.broadcast %cst_12 : f32 to vector<6x1x128xf32>
    %c0_13 = arith.constant 0 : index
    %c9 = arith.constant 9 : index
    %c0_14 = arith.constant 0 : index
    %31 = vector.load %arg9[%c0_13, %c9, %c0_14] : memref<6x10x128xf32, #tpu.memory_space<vmem>>, vector<6x1x128xf32>
    tpu.vector_store %arg9[%c0_13, %c9, %c0_14], %30 {strides = array<i32>} : memref<6x10x128xf32, #tpu.memory_space<vmem>>, vector<6x1x128xf32>,
    %c0_15 = arith.constant 0 : index
    %c1 = arith.constant 1 : index
    %c0_16 = arith.constant 0 : index
    %32 = vector.load %arg9[%c0_15, %c1, %c0_16] : memref<6x10x128xf32, #tpu.memory_space<vmem>>, vector<6x8x128xf32>
    tpu.vector_store %arg9[%c0_15, %c1, %c0_16], %27 {strides = array<i32>} : memref<6x10x128xf32, #tpu.memory_space<vmem>>, vector<6x8x128xf32>,
    %cst_17 = arith.constant 0.000000e+00 : f32
    %33 = vector.broadcast %cst_17 : f32 to vector<32x128xf32>
    %c0_18 = arith.constant 0 : index
    %c0_19 = arith.constant 0 : index
    %c0_20 = arith.constant 0 : index
    %34 = vector.load %arg9[%c0_18, %c0_19, %c0_20] : memref<6x10x128xf32, #tpu.memory_space<vmem>>, vector<6x8x128xf32>
    %35 = vector.shape_cast %34 : vector<6x8x128xf32> to vector<48x128xf32>
    %36 = vector.extract_strided_slice %35 {offsets = [0, 0], sizes = [32, 128], strides = [1, 1]} : vector<48x128xf32> to vector<32x128xf32>
    %c0_21 = arith.constant 0 : index
    %c0_22 = arith.constant 0 : index
    %c0_23 = arith.constant 0 : index
    %c0_24 = arith.constant 0 : index
    %37 = vector.load %arg3[%c0_21, %c0_22, %c0_23, %c0_24] : memref<3x3x128x128xf32, #tpu.memory_space<vmem>>, vector<1x1x128x128xf32>
    %38 = vector.shape_cast %37 : vector<1x1x128x128xf32> to vector<128x128xf32>
    %cst_25 = arith.constant dense<0.000000e+00> : vector<32x128xf32>
    %39 = tpu.matmul %36, %38, %cst_25 {dimension_numbers = #tpu.dot_dimension_numbers<[1], [0], [0], [1], [0, 0, 1, 1], [], []>} : vector<32x128xf32>, vector<128x128xf32>, vector<32x128xf32> -> vector<32x128xf32>
    %40 = arith.addf %33, %39 : vector<32x128xf32>
    %41 = vector.extract_strided_slice %35 {offsets = [8, 0], sizes = [32, 128], strides = [1, 1]} : vector<48x128xf32> to vector<32x128xf32>
    %c1_26 = arith.constant 1 : index
    %c0_27 = arith.constant 0 : index
    %c0_28 = arith.constant 0 : index
    %c0_29 = arith.constant 0 : index
    %42 = vector.load %arg3[%c1_26, %c0_27, %c0_28, %c0_29] : memref<3x3x128x128xf32, #tpu.memory_space<vmem>>, vector<1x1x128x128xf32>
    %43 = vector.shape_cast %42 : vector<1x1x128x128xf32> to vector<128x128xf32>
    %cst_30 = arith.constant dense<0.000000e+00> : vector<32x128xf32>
    %44 = tpu.matmul %41, %43, %cst_30 {dimension_numbers = #tpu.dot_dimension_numbers<[1], [0], [0], [1], [0, 0, 1, 1], [], []>} : vector<32x128xf32>, vector<128x128xf32>, vector<32x128xf32> -> vector<32x128xf32>
    %45 = arith.addf %40, %44 : vector<32x128xf32>
    %46 = vector.extract_strided_slice %35 {offsets = [16, 0], sizes = [32, 128], strides = [1, 1]} : vector<48x128xf32> to vector<32x128xf32>
    %c2 = arith.constant 2 : index
    %c0_31 = arith.constant 0 : index
    %c0_32 = arith.constant 0 : index
    %c0_33 = arith.constant 0 : index
    %47 = vector.load %arg3[%c2, %c0_31, %c0_32, %c0_33] : memref<3x3x128x128xf32, #tpu.memory_space<vmem>>, vector<1x1x128x128xf32>
    %48 = vector.shape_cast %47 : vector<1x1x128x128xf32> to vector<128x128xf32>
    %cst_34 = arith.constant dense<0.000000e+00> : vector<32x128xf32>
    %49 = tpu.matmul %46, %48, %cst_34 {dimension_numbers = #tpu.dot_dimension_numbers<[1], [0], [0], [1], [0, 0, 1, 1], [], []>} : vector<32x128xf32>, vector<128x128xf32>, vector<32x128xf32> -> vector<32x128xf32>
    %50 = arith.addf %45, %49 : vector<32x128xf32>
    %c0_35 = arith.constant 0 : index
    %c1_36 = arith.constant 1 : index
    %c0_37 = arith.constant 0 : index
    %51 = vector.load %arg9[%c0_35, %c1_36, %c0_37] : memref<6x10x128xf32, #tpu.memory_space<vmem>>, vector<6x8x128xf32>
    %52 = vector.shape_cast %51 : vector<6x8x128xf32> to vector<48x128xf32>
    %53 = vector.extract_strided_slice %52 {offsets = [0, 0], sizes = [32, 128], strides = [1, 1]} : vector<48x128xf32> to vector<32x128xf32>
    %c0_38 = arith.constant 0 : index
    %c1_39 = arith.constant 1 : index
    %c0_40 = arith.constant 0 : index
    %c0_41 = arith.constant 0 : index
    %54 = vector.load %arg3[%c0_38, %c1_39, %c0_40, %c0_41] : memref<3x3x128x128xf32, #tpu.memory_space<vmem>>, vector<1x1x128x128xf32>
    %55 = vector.shape_cast %54 : vector<1x1x128x128xf32> to vector<128x128xf32>
    %cst_42 = arith.constant dense<0.000000e+00> : vector<32x128xf32>
    %56 = tpu.matmul %53, %55, %cst_42 {dimension_numbers = #tpu.dot_dimension_numbers<[1], [0], [0], [1], [0, 0, 1, 1], [], []>} : vector<32x128xf32>, vector<128x128xf32>, vector<32x128xf32> -> vector<32x128xf32>
    %57 = arith.addf %50, %56 : vector<32x128xf32>
    %58 = vector.extract_strided_slice %52 {offsets = [8, 0], sizes = [32, 128], strides = [1, 1]} : vector<48x128xf32> to vector<32x128xf32>
    %c1_43 = arith.constant 1 : index
    %c1_44 = arith.constant 1 : index
    %c0_45 = arith.constant 0 : index
    %c0_46 = arith.constant 0 : index
    %59 = vector.load %arg3[%c1_43, %c1_44, %c0_45, %c0_46] : memref<3x3x128x128xf32, #tpu.memory_space<vmem>>, vector<1x1x128x128xf32>
    %60 = vector.shape_cast %59 : vector<1x1x128x128xf32> to vector<128x128xf32>
    %cst_47 = arith.constant dense<0.000000e+00> : vector<32x128xf32>
    %61 = tpu.matmul %58, %60, %cst_47 {dimension_numbers = #tpu.dot_dimension_numbers<[1], [0], [0], [1], [0, 0, 1, 1], [], []>} : vector<32x128xf32>, vector<128x128xf32>, vector<32x128xf32> -> vector<32x128xf32>
    %62 = arith.addf %57, %61 : vector<32x128xf32>
    %63 = vector.extract_strided_slice %52 {offsets = [16, 0], sizes = [32, 128], strides = [1, 1]} : vector<48x128xf32> to vector<32x128xf32>
    %c2_48 = arith.constant 2 : index
    %c1_49 = arith.constant 1 : index
    %c0_50 = arith.constant 0 : index
    %c0_51 = arith.constant 0 : index
    %64 = vector.load %arg3[%c2_48, %c1_49, %c0_50, %c0_51] : memref<3x3x128x128xf32, #tpu.memory_space<vmem>>, vector<1x1x128x128xf32>
    %65 = vector.shape_cast %64 : vector<1x1x128x128xf32> to vector<128x128xf32>
    %cst_52 = arith.constant dense<0.000000e+00> : vector<32x128xf32>
    %66 = tpu.matmul %63, %65, %cst_52 {dimension_numbers = #tpu.dot_dimension_numbers<[1], [0], [0], [1], [0, 0, 1, 1], [], []>} : vector<32x128xf32>, vector<128x128xf32>, vector<32x128xf32> -> vector<32x128xf32>
    %67 = arith.addf %62, %66 : vector<32x128xf32>
    %c0_53 = arith.constant 0 : index
    %c2_54 = arith.constant 2 : index
    %c0_55 = arith.constant 0 : index
    %68 = vector.load %arg9[%c0_53, %c2_54, %c0_55] : memref<6x10x128xf32, #tpu.memory_space<vmem>>, vector<6x8x128xf32>
    %69 = vector.shape_cast %68 : vector<6x8x128xf32> to vector<48x128xf32>
    %70 = vector.extract_strided_slice %69 {offsets = [0, 0], sizes = [32, 128], strides = [1, 1]} : vector<48x128xf32> to vector<32x128xf32>
    %c0_56 = arith.constant 0 : index
    %c2_57 = arith.constant 2 : index
    %c0_58 = arith.constant 0 : index
    %c0_59 = arith.constant 0 : index
    %71 = vector.load %arg3[%c0_56, %c2_57, %c0_58, %c0_59] : memref<3x3x128x128xf32, #tpu.memory_space<vmem>>, vector<1x1x128x128xf32>
    %72 = vector.shape_cast %71 : vector<1x1x128x128xf32> to vector<128x128xf32>
    %cst_60 = arith.constant dense<0.000000e+00> : vector<32x128xf32>
    %73 = tpu.matmul %70, %72, %cst_60 {dimension_numbers = #tpu.dot_dimension_numbers<[1], [0], [0], [1], [0, 0, 1, 1], [], []>} : vector<32x128xf32>, vector<128x128xf32>, vector<32x128xf32> -> vector<32x128xf32>
    %74 = arith.addf %67, %73 : vector<32x128xf32>
    %75 = vector.extract_strided_slice %69 {offsets = [8, 0], sizes = [32, 128], strides = [1, 1]} : vector<48x128xf32> to vector<32x128xf32>
    %c1_61 = arith.constant 1 : index
    %c2_62 = arith.constant 2 : index
    %c0_63 = arith.constant 0 : index
    %c0_64 = arith.constant 0 : index
    %76 = vector.load %arg3[%c1_61, %c2_62, %c0_63, %c0_64] : memref<3x3x128x128xf32, #tpu.memory_space<vmem>>, vector<1x1x128x128xf32>
    %77 = vector.shape_cast %76 : vector<1x1x128x128xf32> to vector<128x128xf32>
    %cst_65 = arith.constant dense<0.000000e+00> : vector<32x128xf32>
    %78 = tpu.matmul %75, %77, %cst_65 {dimension_numbers = #tpu.dot_dimension_numbers<[1], [0], [0], [1], [0, 0, 1, 1], [], []>} : vector<32x128xf32>, vector<128x128xf32>, vector<32x128xf32> -> vector<32x128xf32>
    %79 = arith.addf %74, %78 : vector<32x128xf32>
    %80 = vector.extract_strided_slice %69 {offsets = [16, 0], sizes = [32, 128], strides = [1, 1]} : vector<48x128xf32> to vector<32x128xf32>
    %c2_66 = arith.constant 2 : index
    %c2_67 = arith.constant 2 : index
    %c0_68 = arith.constant 0 : index
    %c0_69 = arith.constant 0 : index
    %81 = vector.load %arg3[%c2_66, %c2_67, %c0_68, %c0_69] : memref<3x3x128x128xf32, #tpu.memory_space<vmem>>, vector<1x1x128x128xf32>
    %82 = vector.shape_cast %81 : vector<1x1x128x128xf32> to vector<128x128xf32>
    %cst_70 = arith.constant dense<0.000000e+00> : vector<32x128xf32>
    %83 = tpu.matmul %80, %82, %cst_70 {dimension_numbers = #tpu.dot_dimension_numbers<[1], [0], [0], [1], [0, 0, 1, 1], [], []>} : vector<32x128xf32>, vector<128x128xf32>, vector<32x128xf32> -> vector<32x128xf32>
    %84 = arith.addf %79, %83 : vector<32x128xf32>
    %85 = vector.shape_cast %84 : vector<32x128xf32> to vector<1x4x8x128xf32>
    %c0_71 = arith.constant 0 : index
    %c0_72 = arith.constant 0 : index
    %c0_73 = arith.constant 0 : index
    %c0_74 = arith.constant 0 : index
    %86 = vector.load %arg6[%c0_71, %c0_72, %c0_73, %c0_74] : memref<1x4x8x128xf32, #tpu.memory_space<vmem>>, vector<1x4x8x128xf32>
    tpu.vector_store %arg6[%c0_71, %c0_72, %c0_73, %c0_74], %85 {strides = array<i32>} : memref<1x4x8x128xf32, #tpu.memory_space<vmem>>, vector<1x4x8x128xf32>,
    %cst_75 = arith.constant dense<0.000000e+00> : vector<128xf32>
    %87 = vector.multi_reduction <add>, %84, %cst_75 [0] : vector<32x128xf32> to vector<128xf32>
    %88 = vector.shape_cast %87 : vector<128xf32> to vector<1x128xf32>
    %89 = vector.shape_cast %88 : vector<1x128xf32> to vector<1x1x1x128xf32>
    %c0_76 = arith.constant 0 : index
    %c0_77 = arith.constant 0 : index
    %c0_78 = arith.constant 0 : index
    %c0_79 = arith.constant 0 : index
    %90 = vector.load %arg7[%c0_76, %c0_77, %c0_78, %c0_79] : memref<1x1x1x128xf32, #tpu.memory_space<vmem>>, vector<1x1x1x128xf32>
    tpu.vector_store %arg7[%c0_76, %c0_77, %c0_78, %c0_79], %89 {strides = array<i32>} : memref<1x1x1x128xf32, #tpu.memory_space<vmem>>, vector<1x1x1x128xf32>,
    %91 = arith.mulf %84, %84 : vector<32x128xf32>
    %cst_80 = arith.constant dense<0.000000e+00> : vector<128xf32>
    %92 = vector.multi_reduction <add>, %91, %cst_80 [0] : vector<32x128xf32> to vector<128xf32>
    %93 = vector.shape_cast %92 : vector<128xf32> to vector<1x128xf32>
    %94 = vector.shape_cast %93 : vector<1x128xf32> to vector<1x1x1x128xf32>
    %c0_81 = arith.constant 0 : index
    %c0_82 = arith.constant 0 : index
    %c0_83 = arith.constant 0 : index
    %c0_84 = arith.constant 0 : index
    %95 = vector.load %arg8[%c0_81, %c0_82, %c0_83, %c0_84] : memref<1x1x1x128xf32, #tpu.memory_space<vmem>>, vector<1x1x1x128xf32>
    tpu.vector_store %arg8[%c0_81, %c0_82, %c0_83, %c0_84], %94 {strides = array<i32>} : memref<1x1x1x128xf32, #tpu.memory_space<vmem>>, vector<1x1x1x128xf32>,
    return
  }
  func.func @transform_0(%arg0: i32, %arg1: i32) -> (i32, i32, i32, i32) {
    %c0_i32 = arith.constant 0 : i32
    %c0_i32_0 = arith.constant 0 : i32
    %c0_i32_1 = arith.constant 0 : i32
    %c0_i32_2 = arith.constant 0 : i32
    return %arg0, %c0_i32, %c0_i32_0, %c0_i32_1 : i32, i32, i32, i32
  }
  func.func @transform_1(%arg0: i32, %arg1: i32) -> (i32, i32, i32, i32) {
    %c0_i32 = arith.constant 0 : i32
    %c0_i32_0 = arith.constant 0 : i32
    %c0_i32_1 = arith.constant 0 : i32
    %c0_i32_2 = arith.constant 0 : i32
    %c0_i32_3 = arith.constant 0 : i32
    return %c0_i32, %c0_i32_0, %c0_i32_1, %c0_i32_2 : i32, i32, i32, i32
  }
  func.func @transform_2(%arg0: i32, %arg1: i32) -> (i32, i32) {
    %c0_i32 = arith.constant 0 : i32
    %c0_i32_0 = arith.constant 0 : i32
    %c0_i32_1 = arith.constant 0 : i32
    return %c0_i32, %c0_i32_0 : i32, i32
  }
  func.func @transform_3(%arg0: i32, %arg1: i32) -> (i32, i32) {
    %c0_i32 = arith.constant 0 : i32
    %c0_i32_0 = arith.constant 0 : i32
    %c0_i32_1 = arith.constant 0 : i32
    return %c0_i32, %c0_i32_0 : i32, i32
  }
  func.func @transform_4(%arg0: i32, %arg1: i32) -> (i32, i32, i32, i32) {
    %c0_i32 = arith.constant 0 : i32
    %c0_i32_0 = arith.constant 0 : i32
    %c0_i32_1 = arith.constant 0 : i32
    return %arg0, %arg1, %c0_i32, %c0_i32_0 : i32, i32, i32, i32
  }
  func.func @transform_5(%arg0: i32, %arg1: i32) -> (i32, i32, i32, i32) {
    %c0_i32 = arith.constant 0 : i32
    %c0_i32_0 = arith.constant 0 : i32
    %c0_i32_1 = arith.constant 0 : i32
    return %arg0, %arg1, %c0_i32, %c0_i32_0 : i32, i32, i32, i32
  }
  func.func @transform_6(%arg0: i32, %arg1: i32) -> (i32, i32, i32, i32) {
    %c0_i32 = arith.constant 0 : i32
    %c0_i32_0 = arith.constant 0 : i32
    %c0_i32_1 = arith.constant 0 : i32
    return %arg0, %arg1, %c0_i32, %c0_i32_0 : i32, i32, i32, i32
  }
}

module attributes {stable_mosaic.version = 11 : i64} {
  func.func @_bn_residual_relu_kernel(%arg0: i32, %arg1: memref<32x128xf32, #tpu.memory_space<vmem>>, %arg2: memref<32x128xf32, #tpu.memory_space<vmem>>, %arg3: memref<1x128xf32, #tpu.memory_space<vmem>>, %arg4: memref<1x128xf32, #tpu.memory_space<vmem>>, %arg5: memref<32x128xf32, #tpu.memory_space<vmem>>) attributes {dimension_semantics = [#tpu.dimension_semantics<parallel>], iteration_bounds = array<i64: 4>, scalar_prefetch = 0 : i64, scratch_operands = 0 : i64, tpu.core_type = #tpu.core_type<tc>, window_params = [{transform_indices = @transform_0, window_bounds = array<i64: 32, 128>}, {transform_indices = @transform_1, window_bounds = array<i64: 32, 128>}, {pipeline_mode = #tpu.pipeline_mode<synchronous>, transform_indices = @transform_2, window_bounds = array<i64: 1, 128>}, {pipeline_mode = #tpu.pipeline_mode<synchronous>, transform_indices = @transform_3, window_bounds = array<i64: 1, 128>}, {transform_indices = @transform_4, window_bounds = array<i64: 32, 128>}]} {
    %c0 = arith.constant 0 : index
    %c0_0 = arith.constant 0 : index
    %0 = vector.load %arg2[%c0, %c0_0] : memref<32x128xf32, #tpu.memory_space<vmem>>, vector<32x128xf32>
    %c0_1 = arith.constant 0 : index
    %c0_2 = arith.constant 0 : index
    %1 = vector.load %arg3[%c0_1, %c0_2] : memref<1x128xf32, #tpu.memory_space<vmem>>, vector<1x128xf32>
    %2 = vector.broadcast %1 : vector<1x128xf32> to vector<32x128xf32>
    %3 = arith.mulf %0, %2 : vector<32x128xf32>
    %c0_3 = arith.constant 0 : index
    %c0_4 = arith.constant 0 : index
    %4 = vector.load %arg4[%c0_3, %c0_4] : memref<1x128xf32, #tpu.memory_space<vmem>>, vector<1x128xf32>
    %5 = vector.broadcast %4 : vector<1x128xf32> to vector<32x128xf32>
    %6 = arith.addf %3, %5 : vector<32x128xf32>
    %c0_5 = arith.constant 0 : index
    %c0_6 = arith.constant 0 : index
    %7 = vector.load %arg1[%c0_5, %c0_6] : memref<32x128xf32, #tpu.memory_space<vmem>>, vector<32x128xf32>
    %8 = arith.addf %6, %7 : vector<32x128xf32>
    %cst = arith.constant 0.000000e+00 : f32
    %9 = vector.broadcast %cst : f32 to vector<32x128xf32>
    %10 = arith.maximumf %8, %9 : vector<32x128xf32>
    %c0_7 = arith.constant 0 : index
    %c0_8 = arith.constant 0 : index
    %11 = vector.load %arg5[%c0_7, %c0_8] : memref<32x128xf32, #tpu.memory_space<vmem>>, vector<32x128xf32>
    tpu.vector_store %arg5[%c0_7, %c0_8], %10 {strides = array<i32>} : memref<32x128xf32, #tpu.memory_space<vmem>>, vector<32x128xf32>,
    return
  }
  func.func @transform_0(%arg0: i32) -> (i32, i32) {
    %c0_i32 = arith.constant 0 : i32
    %c0_i32_0 = arith.constant 0 : i32
    return %arg0, %c0_i32 : i32, i32
  }
  func.func @transform_1(%arg0: i32) -> (i32, i32) {
    %c0_i32 = arith.constant 0 : i32
    %c0_i32_0 = arith.constant 0 : i32
    return %arg0, %c0_i32 : i32, i32
  }
  func.func @transform_2(%arg0: i32) -> (i32, i32) {
    %c0_i32 = arith.constant 0 : i32
    %c0_i32_0 = arith.constant 0 : i32
    %c0_i32_1 = arith.constant 0 : i32
    return %c0_i32, %c0_i32_0 : i32, i32
  }
  func.func @transform_3(%arg0: i32) -> (i32, i32) {
    %c0_i32 = arith.constant 0 : i32
    %c0_i32_0 = arith.constant 0 : i32
    %c0_i32_1 = arith.constant 0 : i32
    return %c0_i32, %c0_i32_0 : i32, i32
  }
  func.func @transform_4(%arg0: i32) -> (i32, i32) {
    %c0_i32 = arith.constant 0 : i32
    %c0_i32_0 = arith.constant 0 : i32
    return %arg0, %c0_i32 : i32, i32
  }
}

</mosaic_0001>

<bundles_post_ra>
// kernel: bottleneck_forward.4
= control target key start
LH: loop header
LB: loop body
LE: loop exit
PB: predicated region body
PF: predicated region fallthrough
CT: control target
= control target key end

     0   :  { %s615_s15 = smov 0   ;;  %s704_s0 = inlined_call_operand.vmem [shape: f32[128,128], index: 0, kind: input, shape index: {}]   ;;  %s705_s1 = inlined_call_operand.vmem [shape: f32[128,128], index: 1, kind: input, shape index: {}]   ;;  %s706_s2 = inlined_call_operand.vmem [shape: f32[128,128], index: 2, kind: output, shape index: {0}]   ;;  %s707_s3 = inlined_call_operand.vmem [shape: f32[4,1,128], index: 3, kind: output, shape index: {1}]   ;;  %s708_s4 = inlined_call_operand.vmem [shape: f32[4,1,128], index: 4, kind: output, shape index: {2}]  }
   0x1 LB: > { %s621_s16 = sadd.s32 4294967295, %s588_s15   ;;  %p461_p0 = scmp.ge.s32.totalorder %s588_s15, 1  ;;  %s588_s15 = sphi %s615_s15, %s15_s15  }
   0x2   : > { %p168_p1 = scmp.lt.s32.totalorder %s588_s15, 5 }
   0x4   : > { %p169_p2 = pnand %p461_p0, %p168_p1 }
   0x5   : > { %v222_v0 = vld [vmem:[%s705_s1] sm:$0xff] (!%p169_p2)  ;;  %v223_v1 = vld [vmem:[%s705_s1 + $0x8] sm:$0xff] (!%p169_p2)  ;;  %v224_v2 = vld [vmem:[%s705_s1 + $0x10] sm:$0xff] (!%p169_p2)  ;;  %s462_s23 = sshll.u32 (!%p169_p2), %s621_s16, 2  ;;  %p212_p4 = scmp.lt.s32.totalorder (!%p169_p2), %s621_s16, 3 }
   0x6   : > { %172 = sbr.rel (%p169_p2) target bundleno = 275 (0x113), region = 28  ;;  %v526_v3 = vpack.c.bf16 (!%p169_p2), %v223_v1, %v222_v0  ;;  %v225_v4 = vld [vmem:[%s705_s1 + $0x18] sm:$0xff] (!%p169_p2)  ;;  %p201_p3 = scmp.lt.s32.totalorder (!%p169_p2), %s462_s23, 15  ;;  %v226_v6 = vld [vmem:[%s705_s1 + $0x20] sm:$0xff] (!%p169_p2)  ;;  %v227_v7 = vld [vmem:[%s705_s1 + $0x28] sm:$0xff] (!%p169_p2) }
   0x7   : > { %v530_v5 = vpack.c.bf16 (!%p169_p2), %v225_v4, %v224_v2  ;;  %v534_v8 = vpack.c.bf16 (!%p169_p2), %v227_v7, %v226_v6  ;;  %v228_v9 = vld [vmem:[%s705_s1 + $0x30] sm:$0xff] (!%p169_p2)  ;;  %v229_v10 = vld [vmem:[%s705_s1 + $0x38] sm:$0xff] (!%p169_p2)  ;;  %v230_v14 = vld [vmem:[%s705_s1 + $0x40] sm:$0xff] (!%p169_p2) }
   0x8   : > { %527 = vmatprep.subr.bf16.mxu0 (!%p169_p2), %v526_v3  ;;  %558 = vmatprep.subr.bf16.mxu1 (!%p169_p2), %v526_v3  ;;  %v538_v13 = vpack.c.bf16 (!%p169_p2), %v229_v10, %v228_v9  ;;  %v231_v15 = vld [vmem:[%s705_s1 + $0x48] sm:$0xff] (!%p169_p2)  ;;  %v232_v17 = vld [vmem:[%s705_s1 + $0x50] sm:$0xff] (!%p169_p2)  ;;  %v233_v18 = vld [vmem:[%s705_s1 + $0x58] sm:$0xff] (!%p169_p2) }
   0x9   : > { %529 = vmatpush3.bf16.msra.mxu0 (!%p169_p2), %v526_v3  ;;  %566 = vmatpush3.bf16.msra.mxu1 (!%p169_p2), %v526_v3  ;;  %v542_v16 = vpack.c.bf16 (!%p169_p2), %v231_v15, %v230_v14  ;;  %v546_v19 = vpack.c.bf16 (!%p169_p2), %v233_v18, %v232_v17  ;;  %v234_v20 = vld [vmem:[%s705_s1 + $0x60] sm:$0xff] (!%p169_p2)  ;;  %v235_v21 = vld [vmem:[%s705_s1 + $0x68] sm:$0xff] (!%p169_p2)  ;;  %v236_v23 = vld [vmem:[%s705_s1 + $0x70] sm:$0xff] (!%p169_p2) }
   0xa   : > { %531 = vmatprep.subr.bf16.mxu0 (!%p169_p2), %v530_v5  ;;  %559 = vmatprep.subr.bf16.mxu1 (!%p169_p2), %v530_v5  ;;  %v550_v22 = vpack.c.bf16 (!%p169_p2), %v235_v21, %v234_v20  ;;  %v237_v24 = vld [vmem:[%s705_s1 + $0x78] sm:$0xff] (!%p169_p2) }
   0xb   : > { %v554_v25 = vpack.c.bf16 (!%p169_p2), %v237_v24, %v236_v23 }
   0xd   : > { %s710_s23 = smov (!%p201_p3, %s462_s23), 15  ;;  %533 = vmatpush3.bf16.msra.mxu0 %v530_v5  ;;  %567 = vmatpush3.bf16.msra.mxu1 %v530_v5  ;;  %s712_s16 = smov (!%p212_p4, %s621_s16), 3 }
   0xe   : > { %s463_s30 = sshll.u32 %s710_s23, 3  ;;  %535 = vmatprep.subr.bf16.mxu0 %v534_v8  ;;  %560 = vmatprep.subr.bf16.mxu1 %v534_v8  ;;  %s214_s9 = scalar_lea.vmem %s707_s3, %s712_s16 }
   0xf   : > { %s658_s11 = scalar_lea.vmem %s704_s0, %s463_s30  ;;  %s210_s8 = scalar_lea.vmem %s706_s2, %s463_s30 }
  0x10   : > { %v218_v11 = vld [vmem:[%s658_s11] sm:$0xff]  ;;  %v220_v12 = vld [vmem:[%s658_s11 + $0x10] sm:$0xff]  ;;  %v219_v26 = vld [vmem:[%s658_s11 + $0x8] sm:$0xff]  ;;  %s217_s12 = scalar_lea.vmem %s708_s4, %s712_s16 }
  0x11   : > { %520 = vmatprep.mubr.f32.mxu0 %v218_v11  ;;  %523 = vmatprep.mubr.f32.mxu1 %v220_v12  ;;  %v221_v27 = vld [vmem:[%s658_s11 + $0x18] sm:$0xff] }
  0x12   : > { %537 = vmatpush3.bf16.msra.mxu0 %v534_v8  ;;  %568 = vmatpush3.bf16.msra.mxu1 %v534_v8 }
  0x13   : > { %539 = vmatprep.subr.bf16.mxu0 %v538_v13  ;;  %561 = vmatprep.subr.bf16.mxu1 %v538_v13 }
  0x16   : > { %541 = vmatpush3.bf16.msra.mxu0 %v538_v13  ;;  %569 = vmatpush3.bf16.msra.mxu1 %v538_v13 }
  0x17   : > { %543 = vmatprep.subr.bf16.mxu0 %v542_v16  ;;  %562 = vmatprep.subr.bf16.mxu1 %v542_v16 }
  0x1a   : > { %545 = vmatpush3.bf16.msra.mxu0 %v542_v16  ;;  %570 = vmatpush3.bf16.msra.mxu1 %v542_v16 }
  0x1b   : > { %547 = vmatprep.subr.bf16.mxu0 %v546_v19  ;;  %563 = vmatprep.subr.bf16.mxu1 %v546_v19 }
  0x1e   : > { %549 = vmatpush3.bf16.msra.mxu0 %v546_v19  ;;  %571 = vmatpush3.bf16.msra.mxu1 %v546_v19 }
  0x1f   : > { %551 = vmatprep.subr.bf16.mxu0 %v550_v22  ;;  %564 = vmatprep.subr.bf16.mxu1 %v550_v22 }
  0x22   : > { %553 = vmatpush3.bf16.msra.mxu0 %v550_v22  ;;  %572 = vmatpush3.bf16.msra.mxu1 %v550_v22 }
  0x23   : > { %555 = vmatprep.subr.bf16.mxu0 %v554_v25  ;;  %565 = vmatprep.subr.bf16.mxu1 %v554_v25 }
  0x26   : > { %557 = vmatpush3.bf16.msra.mxu0 %v554_v25  ;;  %573 = vmatpush3.bf16.msra.mxu1 %v554_v25 }
  0x29   : > { %521 = vmatmul.mubr.f32.vlgmr.msra.gmra.mrb[0].mxu0 %v219_v26  ;;  %524 = vmatmul.mubr.f32.vlgmr.msra.gmra.mrb[0].mxu1 %v221_v27 }
  0xfc   : > { %v522_v28 = vpop.f32.mrb[0].mxu0  ;;  %v525_v29 = vpop.f32.mrb[0].mxu1 }
  0xfd   : > { %324 = vst [vmem:[%s210_s8 + $0x8] sm:$0xff] %v522_v28  ;;  %v338_v30 = vmul.f32 %v522_v28, %v522_v28  ;;  %v304_v31 = vpop.f32.mrb[1].mxu0  ;;  %326 = vst [vmem:[%s210_s8 + $0x18] sm:$0xff] %v525_v29  ;;  %v314_v32 = vpop.f32.mrb[1].mxu1  ;;  %v340_v38 = vmul.f32 %v525_v29, %v525_v29 }
  0xfe   : > { %323 = vst [vmem:[%s210_s8] sm:$0xff] %v304_v31  ;;  %v327_v33 = vadd.f32 %v522_v28, %v304_v31  ;;  %v337_v34 = vmul.f32 %v304_v31, %v304_v31  ;;  %325 = vst [vmem:[%s210_s8 + $0x10] sm:$0xff] %v314_v32  ;;  %v339_v35 = vmul.f32 %v314_v32, %v314_v32 }
 0x100   : > { %v341_v36 = vadd.f32 %v338_v30, %v337_v34  ;;  %v328_v37 = vadd.f32 %v327_v33, %v314_v32 }
 0x102   : > { %v329_v39 = vadd.f32 %v525_v29, %v328_v37  ;;  %v342_v40 = vadd.f32 %v341_v36, %v339_v35 }
 0x104   : > { %v330_v41 = vrot.slane %v329_v39, 4  ;;  %v343_v42 = vadd.f32 %v342_v40, %v340_v38 }
 0x106   : > { %v331_v43 = vadd.f32 %v330_v41, %v329_v39  ;;  %v344_v44 = vrot.slane %v343_v42, 4 }
 0x108   : > { %v332_v45 = vrot.slane %v331_v43, 2  ;;  %v345_v46 = vadd.f32 %v344_v44, %v343_v42 }
 0x10a   : > { %v333_v47 = vadd.f32 %v332_v45, %v331_v43  ;;  %v346_v48 = vrot.slane %v345_v46, 2 }
 0x10c   : > { %v334_v49 = vrot.slane %v333_v47, 1  ;;  %v347_v50 = vadd.f32 %v346_v48, %v345_v46 }
 0x10e   : > { %v335_v51 = vadd.f32 %v334_v49, %v333_v47  ;;  %v348_v52 = vrot.slane %v347_v50, 1 }
 0x110   : > { %336 = vst [vmem:[%s214_s9] sm:$0x1] %v335_v51  ;;  %v349_v53 = vadd.f32 %v348_v52, %v347_v50 }
 0x112   : > { %350 = vst [vmem:[%s217_s12] sm:$0x1] %v349_v53 }
 0x113 PF: > { %s15_s15 = sadd.s32 1, %s588_s15  }
 0x114   : > { %p12_p5 = scmp.ge.s32.totalorder %s15_s15, 6  }
 0x116   :  { %14 = sbr.rel (!%p12_p5) target bundleno = 1 (0x1), region = 82 }

// kernel: bottleneck_forward.6
= control target key start
LH: loop header
LB: loop body
LE: loop exit
PB: predicated region body
PF: predicated region fallthrough
CT: control target
= control target key end

     0   :  { %s707_s21 = smov 0   ;;  %s802_s0 = inlined_call_operand.vmem [shape: f32[128,128], index: 0, kind: input, shape index: {}]   ;;  %s803_s1 = inlined_call_operand.vmem [shape: f32[128,128], index: 1, kind: input, shape index: {}]   ;;  %s804_s2 = inlined_call_operand.vmem [shape: f32[1,128], index: 2, kind: input, shape index: {}]   ;;  %s805_s3 = inlined_call_operand.vmem [shape: f32[1,128], index: 3, kind: input, shape index: {}]   ;;  %s806_s4 = inlined_call_operand.vmem [shape: f32[128,128], index: 4, kind: output, shape index: {0}]   ;;  %s807_s5 = inlined_call_operand.vmem [shape: f32[4,1,128], index: 5, kind: output, shape index: {1}]   ;;  %s808_s6 = inlined_call_operand.vmem [shape: f32[4,1,128], index: 6, kind: output, shape index: {2}]  }
   0x1 LB: > { %s713_s22 = sadd.s32 4294967295, %s670_s21   ;;  %p541_p0 = scmp.ge.s32.totalorder %s670_s21, 1  ;;  %s670_s21 = sphi %s707_s21, %s17_s21  }
   0x2   : > { %p218_p1 = scmp.lt.s32.totalorder %s670_s21, 5 }
   0x4   : > { %p219_p2 = pnand %p541_p0, %p218_p1 }
   0x5   : > { %v302_v0 = vld [vmem:[%s803_s1] sm:$0xff] (!%p219_p2)  ;;  %v303_v1 = vld [vmem:[%s803_s1 + $0x8] sm:$0xff] (!%p219_p2)  ;;  %v304_v2 = vld [vmem:[%s803_s1 + $0x10] sm:$0xff] (!%p219_p2)  ;;  %s542_s29 = sshll.u32 (!%p219_p2), %s713_s22, 2  ;;  %p266_p4 = scmp.lt.s32.totalorder (!%p219_p2), %s713_s22, 3 }
   0x6   : > { %222 = sbr.rel (%p219_p2) target bundleno = 274 (0x112), region = 36  ;;  %v608_v3 = vpack.c.bf16 (!%p219_p2), %v303_v1, %v302_v0  ;;  %v305_v4 = vld [vmem:[%s803_s1 + $0x18] sm:$0xff] (!%p219_p2)  ;;  %p255_p3 = scmp.lt.s32.totalorder (!%p219_p2), %s542_s29, 15  ;;  %v306_v6 = vld [vmem:[%s803_s1 + $0x20] sm:$0xff] (!%p219_p2)  ;;  %v307_v7 = vld [vmem:[%s803_s1 + $0x28] sm:$0xff] (!%p219_p2) }
   0x7   : > { %v612_v5 = vpack.c.bf16 (!%p219_p2), %v305_v4, %v304_v2  ;;  %v616_v8 = vpack.c.bf16 (!%p219_p2), %v307_v7, %v306_v6  ;;  %v546_v9 = vld [vmem:[%s804_s2] ss:$0 sm:$0xff] (!%p219_p2)  ;;  %v308_v10 = vld [vmem:[%s803_s1 + $0x30] sm:$0xff] (!%p219_p2)  ;;  %v309_v11 = vld [vmem:[%s803_s1 + $0x38] sm:$0xff] (!%p219_p2) }
   0x8   : > { %609 = vmatprep.subr.bf16.mxu0 (!%p219_p2), %v608_v3  ;;  %640 = vmatprep.subr.bf16.mxu1 (!%p219_p2), %v608_v3  ;;  %v547_v13 = vld [vmem:[%s805_s3] ss:$0 sm:$0xff] (!%p219_p2)  ;;  %v620_v17 = vpack.c.bf16 (!%p219_p2), %v309_v11, %v308_v10  ;;  %v311_v19 = vld [vmem:[%s803_s1 + $0x48] sm:$0xff] (!%p219_p2)  ;;  %v312_v25 = vld [vmem:[%s803_s1 + $0x50] sm:$0xff] (!%p219_p2) }
   0x9   : > { %611 = vmatpush3.bf16.msra.mxu0 (!%p219_p2), %v608_v3  ;;  %648 = vmatpush3.bf16.msra.mxu1 (!%p219_p2), %v608_v3  ;;  %v310_v18 = vld [vmem:[%s803_s1 + $0x40] sm:$0xff] (!%p219_p2)  ;;  %v313_v26 = vld [vmem:[%s803_s1 + $0x58] sm:$0xff] (!%p219_p2)  ;;  %v315_v29 = vld [vmem:[%s803_s1 + $0x68] sm:$0xff] (!%p219_p2) }
   0xa   : > { %613 = vmatprep.subr.bf16.mxu0 (!%p219_p2), %v612_v5  ;;  %641 = vmatprep.subr.bf16.mxu1 (!%p219_p2), %v612_v5  ;;  %v624_v24 = vpack.c.bf16 (!%p219_p2), %v311_v19, %v310_v18  ;;  %v628_v27 = vpack.c.bf16 (!%p219_p2), %v313_v26, %v312_v25  ;;  %v314_v28 = vld [vmem:[%s803_s1 + $0x60] sm:$0xff] (!%p219_p2)  ;;  %v316_v33 = vld [vmem:[%s803_s1 + $0x70] sm:$0xff] (!%p219_p2)  ;;  %v317_v34 = vld [vmem:[%s803_s1 + $0x78] sm:$0xff] (!%p219_p2) }
   0xb   : > { %v632_v32 = vpack.c.bf16 (!%p219_p2), %v315_v29, %v314_v28  ;;  %v636_v37 = vpack.c.bf16 (!%p219_p2), %v317_v34, %v316_v33 }
   0xd   : > { %s810_s29 = smov (!%p255_p3, %s542_s29), 15  ;;  %615 = vmatpush3.bf16.msra.mxu0 %v612_v5  ;;  %649 = vmatpush3.bf16.msra.mxu1 %v612_v5  ;;  %s812_s22 = smov (!%p266_p4, %s713_s22), 3 }
   0xe   : > { %s543_s12 = sshll.u32 %s810_s29, 3  ;;  %617 = vmatprep.subr.bf16.mxu0 %v616_v8  ;;  %642 = vmatprep.subr.bf16.mxu1 %v616_v8  ;;  %s268_s25 = scalar_lea.vmem %s807_s5, %s812_s22 }
   0xf   : > { %s753_s23 = scalar_lea.vmem %s802_s0, %s543_s12  ;;  %s264_s24 = scalar_lea.vmem %s806_s4, %s543_s12 }
  0x10   : > { %v272_v12 = vld [vmem:[%s753_s23] sm:$0xff]  ;;  %v274_v14 = vld [vmem:[%s753_s23 + $0x10] sm:$0xff]  ;;  %v273_v30 = vld [vmem:[%s753_s23 + $0x8] sm:$0xff]  ;;  %s271_s28 = scalar_lea.vmem %s808_s6, %s812_s22 }
  0x11   : > { %v283_v15 = vmul.f32 %v546_v9, %v272_v12  ;;  %v285_v16 = vmul.f32 %v546_v9, %v274_v14  ;;  %619 = vmatpush3.bf16.msra.mxu0 %v616_v8  ;;  %650 = vmatpush3.bf16.msra.mxu1 %v616_v8  ;;  %v275_v31 = vld [vmem:[%s753_s23 + $0x18] sm:$0xff]  ;;  %v284_v35 = vmul.f32 %v546_v9, %v273_v30 }
  0x12   : > { %621 = vmatprep.subr.bf16.mxu0 %v620_v17  ;;  %643 = vmatprep.subr.bf16.mxu1 %v620_v17  ;;  %v286_v36 = vmul.f32 %v546_v9, %v275_v31 }
  0x13   : > { %v294_v20 = vadd.f32 %v547_v13, %v283_v15  ;;  %v296_v21 = vadd.f32 %v547_v13, %v285_v16  ;;  %v295_v38 = vadd.f32 %v547_v13, %v284_v35 }
  0x14   : > { %v297_v39 = vadd.f32 %v547_v13, %v286_v36 }
  0x15   : > { %v298_v22 = vmax.f32 %v294_v20, 0.0  ;;  %v300_v23 = vmax.f32 %v296_v21, 0.0  ;;  %623 = vmatpush3.bf16.msra.mxu0 %v620_v17  ;;  %651 = vmatpush3.bf16.msra.mxu1 %v620_v17  ;;  %v299_v40 = vmax.f32 %v295_v38, 0.0 }
  0x16   : > { %625 = vmatprep.subr.bf16.mxu0 %v624_v24  ;;  %644 = vmatprep.subr.bf16.mxu1 %v624_v24  ;;  %v301_v41 = vmax.f32 %v297_v39, 0.0 }
  0x17   : > { %602 = vmatprep.mubr.f32.mxu0 %v298_v22  ;;  %605 = vmatprep.mubr.f32.mxu1 %v300_v23 }
  0x19   : > { %627 = vmatpush3.bf16.msra.mxu0 %v624_v24  ;;  %652 = vmatpush3.bf16.msra.mxu1 %v624_v24 }
  0x1a   : > { %629 = vmatprep.subr.bf16.mxu0 %v628_v27  ;;  %645 = vmatprep.subr.bf16.mxu1 %v628_v27 }
  0x1d   : > { %631 = vmatpush3.bf16.msra.mxu0 %v628_v27  ;;  %653 = vmatpush3.bf16.msra.mxu1 %v628_v27 }
  0x1e   : > { %633 = vmatprep.subr.bf16.mxu0 %v632_v32  ;;  %646 = vmatprep.subr.bf16.mxu1 %v632_v32 }
  0x21   : > { %635 = vmatpush3.bf16.msra.mxu0 %v632_v32  ;;  %654 = vmatpush3.bf16.msra.mxu1 %v632_v32 }
  0x22   : > { %637 = vmatprep.subr.bf16.mxu0 %v636_v37  ;;  %647 = vmatprep.subr.bf16.mxu1 %v636_v37 }
  0x25   : > { %639 = vmatpush3.bf16.msra.mxu0 %v636_v37  ;;  %655 = vmatpush3.bf16.msra.mxu1 %v636_v37 }
  0x28   : > { %603 = vmatmul.mubr.f32.vlgmr.msra.gmra.mrb[0].mxu0 %v299_v40  ;;  %606 = vmatmul.mubr.f32.vlgmr.msra.gmra.mrb[0].mxu1 %v301_v41 }
  0xfb   : > { %v604_v42 = vpop.f32.mrb[0].mxu0  ;;  %v607_v43 = vpop.f32.mrb[0].mxu1 }
  0xfc   : > { %404 = vst [vmem:[%s264_s24 + $0x8] sm:$0xff] %v604_v42  ;;  %v418_v44 = vmul.f32 %v604_v42, %v604_v42  ;;  %v384_v45 = vpop.f32.mrb[1].mxu0  ;;  %406 = vst [vmem:[%s264_s24 + $0x18] sm:$0xff] %v607_v43  ;;  %v394_v46 = vpop.f32.mrb[1].mxu1  ;;  %v420_v52 = vmul.f32 %v607_v43, %v607_v43 }
  0xfd   : > { %403 = vst [vmem:[%s264_s24] sm:$0xff] %v384_v45  ;;  %v407_v47 = vadd.f32 %v604_v42, %v384_v45  ;;  %v417_v48 = vmul.f32 %v384_v45, %v384_v45  ;;  %405 = vst [vmem:[%s264_s24 + $0x10] sm:$0xff] %v394_v46  ;;  %v419_v49 = vmul.f32 %v394_v46, %v394_v46 }
  0xff   : > { %v421_v50 = vadd.f32 %v418_v44, %v417_v48  ;;  %v408_v51 = vadd.f32 %v407_v47, %v394_v46 }
 0x101   : > { %v409_v53 = vadd.f32 %v607_v43, %v408_v51  ;;  %v422_v54 = vadd.f32 %v421_v50, %v419_v49 }
 0x103   : > { %v410_v55 = vrot.slane %v409_v53, 4  ;;  %v423_v56 = vadd.f32 %v422_v54, %v420_v52 }
 0x105   : > { %v411_v57 = vadd.f32 %v410_v55, %v409_v53  ;;  %v424_v58 = vrot.slane %v423_v56, 4 }
 0x107   : > { %v412_v59 = vrot.slane %v411_v57, 2  ;;  %v425_v60 = vadd.f32 %v424_v58, %v423_v56 }
 0x109   : > { %v413_v61 = vadd.f32 %v412_v59, %v411_v57  ;;  %v426_v62 = vrot.slane %v425_v60, 2 }
 0x10b   : > { %v414_v63 = vrot.slane %v413_v61, 1  ;;  %v427_v0 = vadd.f32 %v426_v62, %v425_v60 }
 0x10d   : > { %v415_v1 = vadd.f32 %v414_v63, %v413_v61  ;;  %v428_v2 = vrot.slane %v427_v0, 1 }
 0x10f   : > { %416 = vst [vmem:[%s268_s25] sm:$0x1] %v415_v1  ;;  %v429_v3 = vadd.f32 %v428_v2, %v427_v0 }
 0x111   : > { %430 = vst [vmem:[%s271_s28] sm:$0x1] %v429_v3 }
 0x112 PF: > { %s17_s21 = sadd.s32 1, %s670_s21  }
 0x113   : > { %p14_p5 = scmp.ge.s32.totalorder %s17_s21, 6  }
 0x115   :  { %16 = sbr.rel (!%p14_p5) target bundleno = 1 (0x1), region = 90 }

// kernel: bottleneck_forward.7
= control target key start
LH: loop header
LB: loop body
LE: loop exit
PB: predicated region body
PF: predicated region fallthrough
CT: control target
= control target key end

     0   :  { %s389_s15 = smov 0   ;;  %s415_s0 = inlined_call_operand.vmem [shape: f32[128,128], index: 0, kind: input, shape index: {}, may-alias: {0,4}]   ;;  %s416_s1 = inlined_call_operand.vmem [shape: f32[128,128], index: 1, kind: input, shape index: {}]   ;;  %s417_s2 = inlined_call_operand.vmem [shape: f32[1,128], index: 2, kind: input, shape index: {}]   ;;  %s418_s3 = inlined_call_operand.vmem [shape: f32[1,128], index: 3, kind: input, shape index: {}]   ;;  %s419_s4 = inlined_call_operand.vmem [shape: f32[128,128], index: 4, kind: output, shape index: {}, may-alias: {0,4}]  }
   0x1 LB: > { %s333_s16 = sadd.s32 4294967295, %s362_s15   ;;  %p337_p0 = scmp.ge.s32.totalorder %s362_s15, 1  ;;  %s362_s15 = sphi %s389_s15, %s14_s15  }
   0x2   : > { %p174_p1 = scmp.lt.s32.totalorder %s362_s15, 5 }
   0x4   : > { %p175_p2 = pnand %p337_p0, %p174_p1 }
   0x5   : > { %s338_s17 = sshll.u32 (!%p175_p2), %s333_s16, 2  ;;  %v344_v0 = vld [vmem:[%s417_s2] ss:$0 sm:$0xff] (!%p175_p2) }
   0x6   : > { %178 = sbr.rel (%p175_p2) target bundleno = 27 (0x1b), region = 36  ;;  %p206_p3 = scmp.lt.s32.totalorder (!%p175_p2), %s338_s17, 15  ;;  %v345_v1 = vld [vmem:[%s418_s3] ss:$0 sm:$0xff] (!%p175_p2) }
   0xd   : > { %s421_s17 = smov (!%p206_p3, %s338_s17), 15 }
   0xe   : > { %s339_s18 = sshll.u32 %s421_s17, 3 }
   0xf   : > { %s209_s23 = scalar_lea.vmem %s415_s0, %s339_s18  ;;  %s215_s26 = scalar_lea.vmem %s416_s1, %s339_s18 }
  0x10   : > { %v223_v2 = vld [vmem:[%s215_s26] sm:$0xff]  ;;  %v224_v3 = vld [vmem:[%s215_s26 + $0x8] sm:$0xff]  ;;  %v225_v4 = vld [vmem:[%s215_s26 + $0x10] sm:$0xff]  ;;  %s221_s5 = scalar_lea.vmem %s419_s4, %s339_s18 }
  0x11   : > { %v226_v5 = vld [vmem:[%s215_s26 + $0x18] sm:$0xff]  ;;  %v234_v6 = vmul.f32 %v344_v0, %v223_v2  ;;  %v235_v7 = vmul.f32 %v344_v0, %v224_v3  ;;  %v236_v8 = vmul.f32 %v344_v0, %v225_v4  ;;  %v249_v10 = vld [vmem:[%s209_s23] sm:$0xff]  ;;  %v250_v11 = vld [vmem:[%s209_s23 + $0x8] sm:$0xff] }
  0x12   : > { %v237_v9 = vmul.f32 %v344_v0, %v226_v5  ;;  %v251_v12 = vld [vmem:[%s209_s23 + $0x10] sm:$0xff]  ;;  %v252_v16 = vld [vmem:[%s209_s23 + $0x18] sm:$0xff] }
  0x13   : > { %v245_v13 = vadd.f32 %v345_v1, %v234_v6  ;;  %v246_v14 = vadd.f32 %v345_v1, %v235_v7  ;;  %v247_v15 = vadd.f32 %v345_v1, %v236_v8 }
  0x14   : > { %v248_v17 = vadd.f32 %v345_v1, %v237_v9 }
  0x15   : > { %v253_v18 = vadd.f32 %v249_v10, %v245_v13  ;;  %v254_v19 = vadd.f32 %v250_v11, %v246_v14  ;;  %v255_v20 = vadd.f32 %v251_v12, %v247_v15 }
  0x16   : > { %v256_v21 = vadd.f32 %v252_v16, %v248_v17 }
  0x17   : > { %v257_v22 = vmax.f32 %v253_v18, 0.0  ;;  %v258_v23 = vmax.f32 %v254_v19, 0.0  ;;  %v259_v24 = vmax.f32 %v255_v20, 0.0 }
  0x18   : > { %v260_v25 = vmax.f32 %v256_v21, 0.0 }
  0x19   : > { %261 = vst [vmem:[%s221_s5] sm:$0xff] %v257_v22  ;;  %262 = vst [vmem:[%s221_s5 + $0x8] sm:$0xff] %v258_v23 }
  0x1a   : > { %263 = vst [vmem:[%s221_s5 + $0x10] sm:$0xff] %v259_v24  ;;  %264 = vst [vmem:[%s221_s5 + $0x18] sm:$0xff] %v260_v25 }
  0x1b PF: > { %s14_s15 = sadd.s32 1, %s362_s15  }
  0x1c   : > { %p11_p4 = scmp.ge.s32.totalorder %s14_s15, 6  }
  0x1e   :  { %13 = sbr.rel (!%p11_p4) target bundleno = 1 (0x1), region = 69 }

// kernel: bottleneck_forward.5
= control target key start
LH: loop header
LB: loop body
LE: loop exit
PB: predicated region body
PF: predicated region fallthrough
CT: control target
= control target key end

     0   :  { %s2706_s21 = smov 0   ;;  %s2708_s22 = smov 0   ;;  %s3390_s0 = inlined_call_operand.vmem [shape: f32[2,10,8,128], index: 0, kind: input, shape index: {}]   ;;  %s3391_s1 = inlined_call_operand.vmem [shape: f32[3,3,128,128], index: 1, kind: input, shape index: {}]   ;;  %s3392_s2 = inlined_call_operand.vmem [shape: f32[1,128], index: 2, kind: input, shape index: {}]   ;;  %s3393_s3 = inlined_call_operand.vmem [shape: f32[1,128], index: 3, kind: input, shape index: {}]   ;;  %s3394_s4 = inlined_call_operand.vmem [shape: f32[2,8,8,128], index: 4, kind: output, shape index: {0}]   ;;  %s3395_s5 = inlined_call_operand.vmem [shape: f32[2,2,1,128], index: 5, kind: output, shape index: {1}]   ;;  %s3396_s6 = inlined_call_operand.vmem [shape: f32[2,2,1,128], index: 6, kind: output, shape index: {2}]  }
   0x1   :  { %s2710_s23 = smov 0   ;;  %s2712_s24 = smov 0  }
   0x2   :  { %s2714_s25 = smov 0  }
   0x3 LB: > { %s26_s26 = sadd.s32 1, %s2660_s23  ;;  %s29_s27 = sadd.s32 1, %s2664_s24  ;;  %s2668_s25 = sphi %s2714_s25, %s17_s25   ;;  %s2664_s24 = sphi %s2712_s24, %s3412_s24   ;;  %s2660_s23 = sphi %s2710_s23, %s3411_s23   ;;  %s2656_s22 = sphi %s2708_s22, %s3410_s22   ;;  %s2652_s21 = sphi %s2706_s21, %s3409_s21  }
   0x4   : > { %p27_p0 = scmp.ge.s32.totalorder %s26_s26, 2  ;;  %p1576_p1 = scmp.ge.s32.totalorder %s2668_s25, 1 }
   0x5   : > { %p235_p2 = scmp.lt.s32.totalorder %s2668_s25, 5 }
   0x6   : > { %s3414_s26 = smov (%p27_p0, %s26_s26), 0  ;;  %s3416_s27 = smov (!%p27_p0, %s29_s27), %s2664_s24 }
   0x7   : > { %p236_p3 = pnand %p1576_p1, %p235_p2  ;;  %p31_p4 = scmp.ge.s32.totalorder %s3416_s27, 2 }
   0x8   : > { %v1587_v0 = vld [vmem:[%s3391_s1 + $0x180] sm:$0xff] (!%p236_p3)  ;;  %v1588_v1 = vld [vmem:[%s3391_s1 + $0x188] sm:$0xff] (!%p236_p3)  ;;  %p283_p5 = scmp.lt.s32.totalorder (!%p236_p3), %s2656_s22, 1  ;;  %v1589_v5 = vld [vmem:[%s3391_s1 + $0x190] sm:$0xff] (!%p236_p3)  ;;  %s2760_s16 = sshll.u32 (!%p236_p3), %s2652_s21, 2  ;;  %v2670_v7 = vmov (!%p236_p3), 0.0  }
   0x9   : > { %s3418_s27 = smov (%p31_p4, %s3416_s27), 0  ;;  %239 = sbr.rel (%p236_p3) target bundleno = 409 (0x199), region = 36 }
   0xa   : > { %v1635_v2 = vld [vmem:[%s3391_s1 + $0x200] sm:$0xff] (!%p236_p3)  ;;  %v2240_v3 = vpack.c.bf16 (!%p236_p3), %v1588_v1, %v1587_v0  ;;  %v1636_v4 = vld [vmem:[%s3391_s1 + $0x208] sm:$0xff] (!%p236_p3)  ;;  %v1590_v6 = vld [vmem:[%s3391_s1 + $0x198] sm:$0xff] (!%p236_p3)  ;;  %396 = vst [vmem:[#allocation2 + $0x10] sm:$0x1] (!%p236_p3), %v2670_v7  ;;  %s1717_s13 = sshll.u32 (!%p236_p3), %s2652_s21, 5  ;;  %v2788_v18 = vstv (!%p236_p3), %s2760_s16 }
   0xb   : > { %395 = vst [vmem:[#allocation2] sm:$0x1] (!%p236_p3), %v2670_v7  ;;  %397 = vst [vmem:[#allocation2 + $0x20] sm:$0x1] (!%p236_p3), %v2670_v7  ;;  %v2368_v8 = vpack.c.bf16 (!%p236_p3), %v1636_v4, %v1635_v2  ;;  %v2244_v9 = vpack.c.bf16 (!%p236_p3), %v1590_v6, %v1589_v5  ;;  %v1637_v10 = vld [vmem:[%s3391_s1 + $0x210] sm:$0xff] (!%p236_p3)  ;;  %v1638_v11 = vld [vmem:[%s3391_s1 + $0x218] sm:$0xff] (!%p236_p3) }
   0xc   : > { %398 = vst [vmem:[#allocation2 + $0x30] sm:$0x1] (!%p236_p3), %v2670_v7  ;;  %399 = vst [vmem:[#allocation2 + $0x40] sm:$0x1] (!%p236_p3), %v2670_v7  ;;  %v1591_v12 = vld [vmem:[%s3391_s1 + $0x1a0] sm:$0xff] (!%p236_p3)  ;;  %2241 = vmatprep.subr.bf16.mxu1 (!%p236_p3), %v2240_v3  ;;  %v2372_v13 = vpack.c.bf16 (!%p236_p3), %v1638_v11, %v1637_v10  ;;  %v1592_v14 = vld [vmem:[%s3391_s1 + $0x1a8] sm:$0xff] (!%p236_p3) }
   0xd   : > { %400 = vst [vmem:[#allocation2 + $0x50] sm:$0x1] (!%p236_p3), %v2670_v7  ;;  %401 = vst [vmem:[#allocation2 + $0x9] sm:$0x1] (!%p236_p3), %v2670_v7  ;;  %v1639_v15 = vld [vmem:[%s3391_s1 + $0x220] sm:$0xff] (!%p236_p3)  ;;  %v1640_v16 = vld [vmem:[%s3391_s1 + $0x228] sm:$0xff] (!%p236_p3)  ;;  %2369 = vmatprep.subr.bf16.mxu0 (!%p236_p3), %v2368_v8  ;;  %2243 = vmatpush3.bf16.msra.mxu1 (!%p236_p3), %v2240_v3  ;;  %v2248_v17 = vpack.c.bf16 (!%p236_p3), %v1592_v14, %v1591_v12 }
   0xe   : > { %402 = vst [vmem:[#allocation2 + $0x19] sm:$0x1] (!%p236_p3), %v2670_v7  ;;  %403 = vst [vmem:[#allocation2 + $0x29] sm:$0x1] (!%p236_p3), %v2670_v7  ;;  %2371 = vmatpush3.bf16.msra.mxu0 (!%p236_p3), %v2368_v8  ;;  %2245 = vmatprep.subr.bf16.mxu1 (!%p236_p3), %v2244_v9  ;;  %v2376_v19 = vpack.c.bf16 (!%p236_p3), %v1640_v16, %v1639_v15  ;;  %v1593_v20 = vld [vmem:[%s3391_s1 + $0x1b0] sm:$0xff] (!%p236_p3)  ;;  %v1594_v21 = vld [vmem:[%s3391_s1 + $0x1b8] sm:$0xff] (!%p236_p3) }
   0xf   : > { %404 = vst [vmem:[#allocation2 + $0x39] sm:$0x1] (!%p236_p3), %v2670_v7  ;;  %405 = vst [vmem:[#allocation2 + $0x49] sm:$0x1] (!%p236_p3), %v2670_v7  ;;  %2373 = vmatprep.subr.bf16.mxu0 (!%p236_p3), %v2372_v13  ;;  %v1641_v22 = vld [vmem:[%s3391_s1 + $0x230] sm:$0xff] (!%p236_p3)  ;;  %v1642_v23 = vld [vmem:[%s3391_s1 + $0x238] sm:$0xff] (!%p236_p3)  ;;  %v2252_v25 = vpack.c.bf16 (!%p236_p3), %v1594_v21, %v1593_v20 }
  0x10   : > { %406 = vst [vmem:[#allocation2 + $0x59] sm:$0x1] %v2670_v7  ;;  %s3420_s22 = smov (!%p283_p5, %s2656_s22), 1  ;;  %v354_v24 = vadd.s32 1, %v2788_v18  ;;  %v1595_v26 = vld [vmem:[%s3391_s1 + $0x1c0] sm:$0xff]  ;;  %v355_v27 = vadd.s32 2, %v2788_v18  ;;  %v2380_v28 = vpack.c.bf16 %v1642_v23, %v1641_v22 }
  0x11   : > { %s2576_s12 = smul.u32 80, %s3420_s22  ;;  %2247 = vmatpush3.bf16.msra.mxu1 %v2244_v9  ;;  %v1596_v29 = vld [vmem:[%s3391_s1 + $0x1c8] sm:$0xff]  ;;  %v1643_v30 = vld [vmem:[%s3391_s1 + $0x240] sm:$0xff]  ;;  %v1597_v39 = vld [vmem:[%s3391_s1 + $0x1d0] sm:$0xff]  ;;  %v356_v57 = vadd.s32 3, %v2788_v18  ;;  %v357_v59 = vadd.s32 4, %v2788_v18 }
  0x12   : > { %2375 = vmatpush3.bf16.msra.mxu0 %v2372_v13  ;;  %2249 = vmatprep.subr.bf16.mxu1 %v2248_v17  ;;  %v1644_v32 = vld [vmem:[%s3391_s1 + $0x248] sm:$0xff]  ;;  %v2825_v33 = vld [vmem:[%s3392_s2] ss:$0 sm:$0xff]  ;;  %vm360_vm0 = vcmp.ge.s32.totalorder %v354_v24, 1  ;;  %vm366_vm1 = vcmp.le.s32.totalorder %v354_v24, 8  ;;  %v2256_v36 = vpack.c.bf16 %v1596_v29, %v1595_v26  ;;  %vm361_vm2 = vcmp.ge.s32.totalorder %v355_v27, 1 }
  0x13   : > { %s287_s28 = scalar_lea.vmem %s3390_s0, %s2576_s12  ;;  %2377 = vmatprep.subr.bf16.mxu0 %v2376_v19  ;;  %v2830_v34 = vld [vmem:[%s3393_s3] ss:$0 sm:$0xff]  ;;  %v2384_v38 = vpack.c.bf16 %v1644_v32, %v1643_v30  ;;  %v1598_v40 = vld [vmem:[%s3391_s1 + $0x1d8] sm:$0xff]  ;;  %vm367_vm3 = vcmp.le.s32.totalorder %v355_v27, 8  ;;  %v1645_v43 = vld [vmem:[%s3391_s1 + $0x250] sm:$0xff]  ;;  %vm362_vm6 = vcmp.ge.s32.totalorder %v356_v57, 1 }
  0x14   : > { %s2805_s9 = scalar_lea.vmem %s287_s28, %s1717_s13  ;;  %v1646_v44 = vld [vmem:[%s3391_s1 + $0x258] sm:$0xff]  ;;  %vm2850_vm4 = vmand %vm360_vm0, %vm366_vm1  ;;  %v2260_v48 = vpack.c.bf16 %v1598_v40, %v1597_v39  ;;  %v1599_v51 = vld [vmem:[%s3391_s1 + $0x1e0] sm:$0xff]  ;;  %vm368_vm7 = vcmp.le.s32.totalorder %v356_v57, 8  ;;  %vm363_vm8 = vcmp.ge.s32.totalorder %v357_v59, 1  ;;  %vm369_vm9 = vcmp.le.s32.totalorder %v357_v59, 8  ;;  %p291_p6 = scmp.lt.s32.totalorder %s2760_s16, 7 }
  0x15   : > { %v316_v31 = vld [vmem:[%s2805_s9 + $0x8] sm:$0xff]  ;;  %2251 = vmatpush3.bf16.msra.mxu1 %v2248_v17  ;;  %v317_v37 = vld [vmem:[%s2805_s9 + $0x10] sm:$0xff]  ;;  %vm2858_vm5 = vmand %vm361_vm2, %vm367_vm3  ;;  %v2388_v50 = vpack.c.bf16 %v1646_v44, %v1645_v43  ;;  %vm359_vm10 = vcmp.ge.s32.totalorder %v2788_v18, 1  ;;  %vm365_vm11 = vcmp.le.s32.totalorder %v2788_v18, 8  ;;  %s1579_s18 = sshll.u32 %s3420_s22, 3  ;;  %p300_p7 = scmp.lt.s32.totalorder %s2652_s21, 1 }
  0x16   : > { %v329_v35 = vmul.f32 %v2825_v33, %v316_v31  ;;  %2379 = vmatpush3.bf16.msra.mxu0 %v2376_v19  ;;  %2253 = vmatprep.subr.bf16.mxu1 %v2252_v25  ;;  %v330_v42 = vmul.f32 %v2825_v33, %v317_v37  ;;  %v1600_v52 = vld [vmem:[%s3391_s1 + $0x1e8] sm:$0xff]  ;;  %v1647_v55 = vld [vmem:[%s3391_s1 + $0x260] sm:$0xff]  ;;  %v1601_v61 = vld [vmem:[%s3391_s1 + $0x1f0] sm:$0xff]  ;;  %s3422_s16 = smov (!%p291_p6, %s2760_s16), 7 }
  0x17   : > { %2381 = vmatprep.subr.bf16.mxu0 %v2380_v28  ;;  %v1648_v56 = vld [vmem:[%s3391_s1 + $0x268] sm:$0xff]  ;;  %v2264_v60 = vpack.c.bf16 %v1600_v52, %v1599_v51  ;;  %v1602_v62 = vld [vmem:[%s3391_s1 + $0x1f8] sm:$0xff]  ;;  %v1649_v1 = vld [vmem:[%s3391_s1 + $0x270] sm:$0xff]  ;;  %s294_s19 = sadd.s32 %s1579_s18, %s3422_s16  ;;  %s3424_s21 = smov (!%p300_p7, %s2652_s21), 1 }
  0x18   : > { %v342_v41 = vadd.f32 %v2830_v34, %v329_v35  ;;  %v343_v47 = vadd.f32 %v2830_v34, %v330_v42  ;;  %v2392_v63 = vpack.c.bf16 %v1648_v56, %v1647_v55  ;;  %v318_v0 = vld [vmem:[%s2805_s9 + $0x18] sm:$0xff]  ;;  %v2268_v4 = vpack.c.bf16 %v1602_v62, %v1601_v61  ;;  %v319_v5 = vld [vmem:[%s2805_s9 + $0x20] sm:$0xff]  ;;  %v420_v13 = vld [vmem:[%s3391_s1 + $0x8] sm:$0xff]  ;;  %s1580_s20 = sshll.u32 %s294_s19, 3  ;;  %s1581_s16 = sshll.u32 %s3420_s22, 1 }
  0x19   : > { %2255 = vmatpush3.bf16.msra.mxu1 %v2252_v25  ;;  %v1650_v2 = vld [vmem:[%s3391_s1 + $0x278] sm:$0xff]  ;;  %v331_v3 = vmul.f32 %v2825_v33, %v318_v0  ;;  %v315_v6 = vld [vmem:[%s2805_s9] sm:$0xff]  ;;  %v332_v9 = vmul.f32 %v2825_v33, %v319_v5  ;;  %vm2918_vm12 = vmand %vm362_vm6, %vm368_vm7  ;;  %s296_s30 = scalar_lea.vmem %s3394_s4, %s1580_s20  ;;  %s303_s7 = sadd.s32 %s1581_s16, %s3424_s21 }
  0x1a   : > { %v2854_v46 = vmax.f32 %v342_v41, 0.0  ;;  %2383 = vmatpush3.bf16.msra.mxu0 %v2380_v28  ;;  %2257 = vmatprep.subr.bf16.mxu1 %v2256_v36  ;;  %v2871_v54 = vmax.f32 %v343_v47, 0.0  ;;  %v419_v7 = vld [vmem:[%s3391_s1] sm:$0xff]  ;;  %v328_v10 = vmul.f32 %v2825_v33, %v315_v6  ;;  %v2396_v11 = vpack.c.bf16 %v1650_v2, %v1649_v1  ;;  %v1652_v16 = vld [vmem:[%s3391_s1 + $0x388] sm:$0xff]  ;;  %vm2934_vm13 = vmand %vm363_vm8, %vm369_vm9  ;;  %s304_s11 = scalar_lea.vmem %s3395_s5, %s303_s7 }
  0x1b   : > { %2385 = vmatprep.subr.bf16.mxu0 %v2384_v38  ;;  %v344_v8 = vadd.f32 %v2830_v34, %v331_v3  ;;  %v1651_v15 = vld [vmem:[%s3391_s1 + $0x380] sm:$0xff]  ;;  %v345_v19 = vadd.f32 %v2830_v34, %v332_v9  ;;  %vm2943_vm14 = vmand %vm359_vm10, %vm365_vm11  ;;  %v2272_v23 = vpack.c.bf16 %v420_v13, %v419_v7  ;;  %v421_v28 = vld [vmem:[%s3391_s1 + $0x10] sm:$0xff] }
  0x1c   : > { %v390_v53 = vsel %vm2850_vm4, %v2854_v46, 0.0  ;;  %2618 = vmatprep.mubr.msk.f32.mxu0 %vm2850_vm4, %v2854_v46  ;;  %v391_v58 = vsel %vm2858_vm5, %v2871_v54, 0.0  ;;  %v2939_v21 = vadd.f32 %v2830_v34, %v328_v10  ;;  %v2400_v27 = vpack.c.bf16 %v1652_v16, %v1651_v15  ;;  %v422_v29 = vld [vmem:[%s3391_s1 + $0x18] sm:$0xff]  ;;  %v1653_v30 = vld [vmem:[%s3391_s1 + $0x390] sm:$0xff]  ;;  %v423_v40 = vld [vmem:[%s3391_s1 + $0x20] sm:$0xff] }
  0x1d   : > { %408 = vst [vmem:[#allocation2 + $0x11] sm:$0xff] %v390_v53  ;;  %2259 = vmatpush3.bf16.msra.mxu1 %v2256_v36  ;;  %409 = vst [vmem:[#allocation2 + $0x21] sm:$0xff] %v391_v58  ;;  %v2929_v17 = vmax.f32 %v344_v8, 0.0  ;;  %v2950_v25 = vmax.f32 %v345_v19, 0.0  ;;  %v1654_v31 = vld [vmem:[%s3391_s1 + $0x398] sm:$0xff]  ;;  %v2276_v37 = vpack.c.bf16 %v422_v29, %v421_v28  ;;  %v424_v41 = vld [vmem:[%s3391_s1 + $0x28] sm:$0xff] }
  0x1e   : > { %2387 = vmatpush3.bf16.msra.mxu0 %v2384_v38  ;;  %2261 = vmatprep.subr.bf16.mxu1 %v2260_v48  ;;  %v347_v26 = vmax.f32 %v2939_v21, 0.0  ;;  %v358_v38 = vadd.s32 5, %v2788_v18  ;;  %v2404_v39 = vpack.c.bf16 %v1654_v31, %v1653_v30  ;;  %v1655_v42 = vld [vmem:[%s3391_s1 + $0x3a0] sm:$0xff]  ;;  %v1656_v18 = vld [vmem:[%s3391_s1 + $0x3a8] sm:$0xff]  ;;  %v2280_v44 = vpack.c.bf16 %v424_v41, %v423_v40  ;;  %v425_v51 = vld [vmem:[%s3391_s1 + $0x30] sm:$0xff] }
  0x1f   : > { %2389 = vmatprep.subr.bf16.mxu0 %v2388_v50  ;;  %v392_v24 = vsel %vm2918_vm12, %v2929_v17, 0.0  ;;  %v393_v32 = vsel %vm2934_vm13, %v2950_v25, 0.0  ;;  %v320_v43 = vld [vmem:[%s2805_s9 + $0x28] sm:$0xff]  ;;  %v426_v52 = vld [vmem:[%s3391_s1 + $0x38] sm:$0xff]  ;;  %v1657_v53 = vld [vmem:[%s3391_s1 + $0x3b0] sm:$0xff]  ;;  %s311_s9 = scalar_lea.vmem %s3396_s6, %s303_s7 }
  0x20   : > { %410 = vst [vmem:[#allocation2 + $0x31] sm:$0xff] %v392_v24  ;;  %v389_v35 = vsel %vm2943_vm14, %v347_v26, 0.0  ;;  %411 = vst [vmem:[#allocation2 + $0x41] sm:$0xff] %v393_v32  ;;  %vm364_vm15 = vcmp.ge.s32.totalorder %v358_v38, 1  ;;  %vm370_vm0 = vcmp.le.s32.totalorder %v358_v38, 8  ;;  %v2284_v59 = vpack.c.bf16 %v426_v52, %v425_v51  ;;  %v428_v62 = vld [vmem:[%s3391_s1 + $0x48] sm:$0xff] }
  0x21   : > { %2263 = vmatpush3.bf16.msra.mxu1 %v2260_v48  ;;  %407 = vst [vmem:[#allocation2 + $0x1] sm:$0xff] %v389_v35  ;;  %v333_v48 = vmul.f32 %v2825_v33, %v320_v43  ;;  %v1658_v33 = vld [vmem:[%s3391_s1 + $0x3b8] sm:$0xff]  ;;  %vm3020_vm1 = vmand %vm364_vm15, %vm370_vm0  ;;  %v1660_v0 = vld [vmem:[%s3391_s1 + $0x3c8] sm:$0xff] }
  0x22   : > { %2391 = vmatpush3.bf16.msra.mxu0 %v2388_v50  ;;  %2265 = vmatprep.subr.bf16.mxu1 %v2264_v60  ;;  %v2408_v50 = vpack.c.bf16 %v1656_v18, %v1655_v42  ;;  %v2412_v61 = vpack.c.bf16 %v1658_v33, %v1657_v53  ;;  %v430_v5 = vld [vmem:[%s3391_s1 + $0x58] sm:$0xff]  ;;  %v1661_v6 = vld [vmem:[%s3391_s1 + $0x3d0] sm:$0xff]  ;;  %v431_v10 = vld [vmem:[%s3391_s1 + $0x60] sm:$0xff] }
  0x23   : > { %2393 = vmatprep.subr.bf16.mxu0 %v2392_v63  ;;  %v3014_v56 = vadd.f32 %v2830_v34, %v333_v48  ;;  %v427_v34 = vld [vmem:[%s3391_s1 + $0x40] sm:$0xff]  ;;  %v1662_v7 = vld [vmem:[%s3391_s1 + $0x3d8] sm:$0xff]  ;;  %v1664_v15 = vld [vmem:[%s3391_s1 + $0x3e8] sm:$0xff] }
  0x24   : > { %v2911_v12 = vld [vmem:[#allocation2 + $0x10] sm:$0xff]  ;;  %v2972_v36 = vld [vmem:[#allocation2 + $0x20] sm:$0xff]  ;;  %v2288_v2 = vpack.c.bf16 %v428_v62, %v427_v34  ;;  %v2420_v9 = vpack.c.bf16 %v1662_v7, %v1661_v6  ;;  %v434_v24 = vld [vmem:[%s3391_s1 + $0x78] sm:$0xff] }
  0x25   : > { %1930 = vmatprep.mubr.f32.mxu1 %v2911_v12  ;;  %2267 = vmatpush3.bf16.msra.mxu1 %v2264_v60  ;;  %v352_v60 = vmax.f32 %v3014_v56, 0.0  ;;  %v1663_v13 = vld [vmem:[%s3391_s1 + $0x3e0] sm:$0xff]  ;;  %v1666_v28 = vld [vmem:[%s3391_s1 + $0x3f8] sm:$0xff]  ;;  %v1604_v32 = vld [vmem:[%s3391_s1 + $0x308] sm:$0xff] }
  0x26   : > { %2395 = vmatpush3.bf16.msra.mxu0 %v2392_v63  ;;  %2269 = vmatprep.subr.bf16.mxu1 %v2268_v4  ;;  %v1659_v63 = vld [vmem:[%s3391_s1 + $0x3c0] sm:$0xff]  ;;  %v2424_v19 = vpack.c.bf16 %v1664_v15, %v1663_v13  ;;  %v1605_v40 = vld [vmem:[%s3391_s1 + $0x310] sm:$0xff]  ;;  %v1606_v41 = vld [vmem:[%s3391_s1 + $0x318] sm:$0xff] }
  0x27   : > { %2397 = vmatprep.subr.bf16.mxu0 %v2396_v11  ;;  %v2992_v47 = vld [vmem:[#allocation2 + $0x30] sm:$0xff]  ;;  %v3011_v55 = vld [vmem:[#allocation2 + $0x40] sm:$0xff]  ;;  %v394_v1 = vsel %vm3020_vm1, %v352_v60, 0.0  ;;  %v2416_v3 = vpack.c.bf16 %v1660_v0, %v1659_v63  ;;  %v1670_v18 = vld [vmem:[%s3391_s1 + $0x118] sm:$0xff]  ;;  %v2308_v43 = vpack.c.bf16 %v1606_v41, %v1605_v40 }
  0x28   : > { %v413_v57 = vld [vmem:[#allocation2] sm:$0xff]  ;;  %412 = vst [vmem:[#allocation2 + $0x51] sm:$0xff] %v394_v1  ;;  %v1669_v42 = vld [vmem:[%s3391_s1 + $0x110] sm:$0xff]  ;;  %v1672_v52 = vld [vmem:[%s3391_s1 + $0x128] sm:$0xff] }
  0x29   : > { %2271 = vmatpush3.bf16.msra.mxu1 %v2268_v4  ;;  %v429_v4 = vld [vmem:[%s3391_s1 + $0x50] sm:$0xff]  ;;  %v1603_v31 = vld [vmem:[%s3391_s1 + $0x300] sm:$0xff]  ;;  %v1612_v20 = vld [vmem:[%s3391_s1 + $0x348] sm:$0xff] }
  0x2a   : > { %2399 = vmatpush3.bf16.msra.mxu0 %v2396_v11  ;;  %2273 = vmatprep.subr.bf16.mxu1 %v2272_v23  ;;  %v2292_v8 = vpack.c.bf16 %v430_v5, %v429_v4  ;;  %v432_v11 = vld [vmem:[%s3391_s1 + $0x68] sm:$0xff]  ;;  %v1667_v35 = vld [vmem:[%s3391_s1 + $0x100] sm:$0xff]  ;;  %v2304_v38 = vpack.c.bf16 %v1604_v32, %v1603_v31  ;;  %v1613_v1 = vld [vmem:[%s3391_s1 + $0x350] sm:$0xff] }
  0x2b   : > { %2401 = vmatprep.subr.bf16.mxu0 %v2400_v27  ;;  %v2296_v16 = vpack.c.bf16 %v432_v11, %v431_v10  ;;  %v1607_v48 = vld [vmem:[%s3391_s1 + $0x320] sm:$0xff]  ;;  %v1676_v56 = vld [vmem:[%s3391_s1 + $0x148] sm:$0xff]  ;;  %v1617_v13 = vld [vmem:[%s3391_s1 + $0x370] sm:$0xff] }
  0x2c   : > { %1931 = vmatmul.mubr.f32.vlgmr.msra.gmra.mrb[0].mxu1 %v2972_v36  ;;  %v1671_v51 = vld [vmem:[%s3391_s1 + $0x120] sm:$0xff]  ;;  %v1616_v7 = vld [vmem:[%s3391_s1 + $0x368] sm:$0xff]  ;;  %v1618_v15 = vld [vmem:[%s3391_s1 + $0x378] sm:$0xff] }
  0x2d   : > { %2275 = vmatpush3.bf16.msra.mxu1 %v2272_v23  ;;  %2619 = vmatmul.mubr.msk.f32.vlgmr.msra.gmra.mrb[0].mxu0 %vm2858_vm5, %v2871_v54  ;;  %v433_v23 = vld [vmem:[%s3391_s1 + $0x70] sm:$0xff]  ;;  %v2440_v33 = vpack.c.bf16 %v1672_v52, %v1671_v51  ;;  %v1052_v34 = vld [vmem:[#allocation2 + $0x2] sm:$0xff]  ;;  %v1630_v22 = vld [vmem:[%s3391_s1 + $0xd8] sm:$0xff] }
  0x2e   : > { %2403 = vmatpush3.bf16.msra.mxu0 %v2400_v27  ;;  %2277 = vmatprep.subr.bf16.mxu1 %v2276_v37  ;;  %v1665_v27 = vld [vmem:[%s3391_s1 + $0x3f0] sm:$0xff]  ;;  %v2300_v29 = vpack.c.bf16 %v434_v24, %v433_v23  ;;  %v1611_v0 = vld [vmem:[%s3391_s1 + $0x340] sm:$0xff]  ;;  %v2332_v23 = vpack.c.bf16 %v1618_v15, %v1617_v13  ;;  %v1700_v15 = vld [vmem:[%s3391_s1 + $0x408] sm:$0xff] }
  0x2f   : > { %2405 = vmatprep.subr.bf16.mxu0 %v2404_v39  ;;  %1933 = vmatprep.mubr.f32.mxu1 %v2992_v47  ;;  %v2428_v30 = vpack.c.bf16 %v1666_v28, %v1665_v27  ;;  %v2320_v58 = vpack.c.bf16 %v1612_v20, %v1611_v0  ;;  %v1615_v6 = vld [vmem:[%s3391_s1 + $0x360] sm:$0xff]  ;;  %v1620_v28 = vld [vmem:[%s3391_s1 + $0x88] sm:$0xff]  ;;  %v1053_v40 = vld [vmem:[#allocation2 + $0x12] sm:$0xff] }
  0x30   : > { %2620 = vmatprep.mubr.msk.f32.mxu0 %vm2918_vm12, %v2929_v17  ;;  %1934 = vmatmul.mubr.f32.gmra.mrb[2].mxu1 %v3011_v55  ;;  %v2328_v10 = vpack.c.bf16 %v1616_v7, %v1615_v6  ;;  %v1619_v27 = vld [vmem:[%s3391_s1 + $0x80] sm:$0xff]  ;;  %v418_v51 = vld [vmem:[#allocation2 + $0x50] sm:$0xff]  ;;  %v1692_v0 = vld [vmem:[%s3391_s1 + $0x2c8] sm:$0xff] }
  0x31   : > { %2279 = vmatpush3.bf16.msra.mxu1 %v2276_v37  ;;  %2621 = vmatmul.mubr.msk.f32.gmra.mrb[2].mxu0 %vm2934_vm13, %v2950_v25  ;;  %v1668_v37 = vld [vmem:[%s3391_s1 + $0x108] sm:$0xff]  ;;  %v2336_v31 = vpack.c.bf16 %v1620_v28, %v1619_v27  ;;  %v1629_v21 = vld [vmem:[%s3391_s1 + $0xd0] sm:$0xff]  ;;  %v1634_v7 = vld [vmem:[%s3391_s1 + $0xf8] sm:$0xff] }
  0x32   : > { %2407 = vmatpush3.bf16.msra.mxu0 %v2404_v39  ;;  %2281 = vmatprep.subr.bf16.mxu1 %v2280_v44  ;;  %v2432_v39 = vpack.c.bf16 %v1668_v37, %v1667_v35  ;;  %v1621_v35 = vld [vmem:[%s3391_s1 + $0x90] sm:$0xff]  ;;  %v1622_v37 = vld [vmem:[%s3391_s1 + $0x98] sm:$0xff]  ;;  %v1699_v13 = vld [vmem:[%s3391_s1 + $0x400] sm:$0xff] }
  0x33   : > { %2409 = vmatprep.subr.bf16.mxu0 %v2408_v50  ;;  %1968 = vmatprep.mubr.f32.mxu1 %v413_v57  ;;  %v1610_v57 = vld [vmem:[%s3391_s1 + $0x338] sm:$0xff]  ;;  %v2340_v41 = vpack.c.bf16 %v1622_v37, %v1621_v35  ;;  %v1633_v6 = vld [vmem:[%s3391_s1 + $0xf0] sm:$0xff]  ;;  %v1703_v27 = vld [vmem:[%s3391_s1 + $0x420] sm:$0xff] }
  0x34   : > { %2622 = vmatprep.mubr.msk.f32.mxu0 %vm2858_vm5, %v2871_v54  ;;  %v1704_v28 = vld [vmem:[%s3391_s1 + $0x428] sm:$0xff]  ;;  %v1706_v45 = vld [vmem:[%s3391_s1 + $0x438] sm:$0xff]  ;;  %v1707_v49 = vld [vmem:[%s3391_s1 + $0x440] sm:$0xff] }
  0x35   : > { %2283 = vmatpush3.bf16.msra.mxu1 %v2280_v44  ;;  %v2436_v44 = vpack.c.bf16 %v1670_v18, %v1669_v42  ;;  %v1623_v18 = vld [vmem:[%s3391_s1 + $0xa0] sm:$0xff] }
  0x36   : > { %2411 = vmatpush3.bf16.msra.mxu0 %v2408_v50  ;;  %2285 = vmatprep.subr.bf16.mxu1 %v2284_v59  ;;  %v1608_v50 = vld [vmem:[%s3391_s1 + $0x328] sm:$0xff]  ;;  %v1711_v37 = vld [vmem:[%s3391_s1 + $0x460] sm:$0xff] }
  0x37   : > { %2413 = vmatprep.subr.bf16.mxu0 %v2412_v61  ;;  %v2312_v53 = vpack.c.bf16 %v1608_v50, %v1607_v48  ;;  %v1688_v48 = vld [vmem:[%s3391_s1 + $0x2a8] sm:$0xff] }
  0x38   : > { %v3228_v50 = vld [vmem:[#allocation2 + $0x22] sm:$0xff] }
  0x39   : > { %2287 = vmatpush3.bf16.msra.mxu1 %v2284_v59  ;;  %v1673_v59 = vld [vmem:[%s3391_s1 + $0x130] sm:$0xff] }
  0x3a   : > { %2415 = vmatpush3.bf16.msra.mxu0 %v2412_v61  ;;  %2289 = vmatprep.subr.bf16.mxu1 %v2288_v2  ;;  %v1674_v61 = vld [vmem:[%s3391_s1 + $0x138] sm:$0xff] }
  0x3b   : > { %2417 = vmatprep.subr.bf16.mxu0 %v2416_v3  ;;  %v2444_v63 = vpack.c.bf16 %v1674_v61, %v1673_v59  ;;  %v1690_v59 = vld [vmem:[%s3391_s1 + $0x2b8] sm:$0xff] }
  0x3d   : > { %2291 = vmatpush3.bf16.msra.mxu1 %v2288_v2  ;;  %v1677_v2 = vld [vmem:[%s3391_s1 + $0x150] sm:$0xff] }
  0x3e   : > { %2419 = vmatpush3.bf16.msra.mxu0 %v2416_v3  ;;  %2293 = vmatprep.subr.bf16.mxu1 %v2292_v8  ;;  %v1678_v3 = vld [vmem:[%s3391_s1 + $0x158] sm:$0xff] }
  0x3f   : > { %2421 = vmatprep.subr.bf16.mxu0 %v2420_v9  ;;  %v2452_v5 = vpack.c.bf16 %v1678_v3, %v1677_v2  ;;  %v1695_v2 = vld [vmem:[%s3391_s1 + $0x2e0] sm:$0xff]  ;;  %v1696_v3 = vld [vmem:[%s3391_s1 + $0x2e8] sm:$0xff] }
  0x41   : > { %2295 = vmatpush3.bf16.msra.mxu1 %v2292_v8  ;;  %v1679_v8 = vld [vmem:[%s3391_s1 + $0x160] sm:$0xff] }
  0x42   : > { %2423 = vmatpush3.bf16.msra.mxu0 %v2420_v9  ;;  %2297 = vmatprep.subr.bf16.mxu1 %v2296_v16  ;;  %v1680_v9 = vld [vmem:[%s3391_s1 + $0x168] sm:$0xff] }
  0x43   : > { %2425 = vmatprep.subr.bf16.mxu0 %v2424_v19  ;;  %v2456_v11 = vpack.c.bf16 %v1680_v9, %v1679_v8  ;;  %v1697_v8 = vld [vmem:[%s3391_s1 + $0x2f0] sm:$0xff]  ;;  %v1698_v9 = vld [vmem:[%s3391_s1 + $0x2f8] sm:$0xff] }
  0x45   : > { %2299 = vmatpush3.bf16.msra.mxu1 %v2296_v16  ;;  %v1681_v16 = vld [vmem:[%s3391_s1 + $0x170] sm:$0xff] }
  0x46   : > { %2427 = vmatpush3.bf16.msra.mxu0 %v2424_v19  ;;  %2301 = vmatprep.subr.bf16.mxu1 %v2300_v29  ;;  %v1682_v19 = vld [vmem:[%s3391_s1 + $0x178] sm:$0xff] }
  0x47   : > { %2429 = vmatprep.subr.bf16.mxu0 %v2428_v30  ;;  %v2460_v24 = vpack.c.bf16 %v1682_v19, %v1681_v16  ;;  %v2496_v16 = vpack.c.bf16 %v1700_v15, %v1699_v13  ;;  %v1701_v19 = vld [vmem:[%s3391_s1 + $0x410] sm:$0xff] }
  0x49   : > { %2303 = vmatpush3.bf16.msra.mxu1 %v2300_v29  ;;  %v1683_v29 = vld [vmem:[%s3391_s1 + $0x280] sm:$0xff] }
  0x4a   : > { %2431 = vmatpush3.bf16.msra.mxu0 %v2428_v30  ;;  %2305 = vmatprep.subr.bf16.mxu1 %v2304_v38  ;;  %v1684_v30 = vld [vmem:[%s3391_s1 + $0x288] sm:$0xff] }
  0x4b   : > { %2433 = vmatprep.subr.bf16.mxu0 %v2432_v39  ;;  %v2464_v32 = vpack.c.bf16 %v1684_v30, %v1683_v29  ;;  %v1056_v29 = vld [vmem:[#allocation2 + $0x42] sm:$0xff]  ;;  %v2504_v30 = vpack.c.bf16 %v1704_v28, %v1703_v27 }
  0x4c   : > { %1969 = vmatmul.mubr.f32.vlgmr.msra.gmra.mrb[0].mxu1 %v2911_v12  ;;  %v1609_v12 = vld [vmem:[%s3391_s1 + $0x330] sm:$0xff] }
  0x4d   : > { %2307 = vmatpush3.bf16.msra.mxu1 %v2304_v38  ;;  %2623 = vmatmul.mubr.msk.f32.vlgmr.msra.gmra.mrb[0].mxu0 %vm2918_vm12, %v2929_v17  ;;  %v2316_v62 = vpack.c.bf16 %v1610_v57, %v1609_v12  ;;  %v1685_v38 = vld [vmem:[%s3391_s1 + $0x290] sm:$0xff]  ;;  %v1626_v12 = vld [vmem:[%s3391_s1 + $0xb8] sm:$0xff] }
  0x4e   : > { %2435 = vmatpush3.bf16.msra.mxu0 %v2432_v39  ;;  %2309 = vmatprep.subr.bf16.mxu1 %v2308_v43  ;;  %v1686_v39 = vld [vmem:[%s3391_s1 + $0x298] sm:$0xff]  ;;  %v1689_v57 = vld [vmem:[%s3391_s1 + $0x2b0] sm:$0xff] }
  0x4f   : > { %2437 = vmatprep.subr.bf16.mxu0 %v2436_v44  ;;  %1971 = vmatprep.mubr.f32.mxu1 %v2972_v36  ;;  %v2468_v42 = vpack.c.bf16 %v1686_v39, %v1685_v38  ;;  %v1712_v38 = vld [vmem:[%s3391_s1 + $0x468] sm:$0xff] }
  0x50   : > { %2624 = vmatprep.mubr.msk.f32.mxu0 %vm2934_vm13, %v2950_v25  ;;  %1972 = vmatmul.mubr.f32.gmra.mrb[2].mxu1 %v2992_v47  ;;  %v1675_v25 = vld [vmem:[%s3391_s1 + $0x140] sm:$0xff]  ;;  %v2520_v39 = vpack.c.bf16 %v1712_v38, %v1711_v37 }
  0x51   : > { %2311 = vmatpush3.bf16.msra.mxu1 %v2308_v43  ;;  %2625 = vmatmul.mubr.msk.f32.gmra.mrb[2].mxu0 %vm3020_vm1, %v352_v60  ;;  %v2448_v60 = vpack.c.bf16 %v1676_v56, %v1675_v25  ;;  %v1624_v43 = vld [vmem:[%s3391_s1 + $0xa8] sm:$0xff]  ;;  %v1694_v56 = vld [vmem:[%s3391_s1 + $0x2d8] sm:$0xff] }
  0x52   : > { %2439 = vmatpush3.bf16.msra.mxu0 %v2436_v44  ;;  %2313 = vmatprep.subr.bf16.mxu1 %v2312_v53  ;;  %v1687_v44 = vld [vmem:[%s3391_s1 + $0x2a0] sm:$0xff]  ;;  %v2344_v52 = vpack.c.bf16 %v1624_v43, %v1623_v18  ;;  %v1057_v18 = vld [vmem:[#allocation2 + $0x52] sm:$0xff] }
  0x53   : > { %2441 = vmatprep.subr.bf16.mxu0 %v2440_v33  ;;  %2006 = vmatprep.mubr.f32.mxu1 %v2972_v36  ;;  %v1614_v36 = vld [vmem:[%s3391_s1 + $0x358] sm:$0xff] }
  0x54   : > { %2158 = vmatprep.mubr.f32.mxu0 %v1052_v34  ;;  %v2324_v4 = vpack.c.bf16 %v1614_v36, %v1613_v1  ;;  %v2476_v34 = vpack.c.bf16 %v1690_v59, %v1689_v57  ;;  %v1631_v1 = vld [vmem:[%s3391_s1 + $0xe0] sm:$0xff]  ;;  %v1632_v36 = vld [vmem:[%s3391_s1 + $0xe8] sm:$0xff] }
  0x55   : > { %2315 = vmatpush3.bf16.msra.mxu1 %v2312_v53  ;;  %v3230_v53 = vld [vmem:[#allocation2 + $0x32] sm:$0xff] }
  0x56   : > { %2443 = vmatpush3.bf16.msra.mxu0 %v2440_v33  ;;  %2317 = vmatprep.subr.bf16.mxu1 %v2316_v62  ;;  %v1625_v33 = vld [vmem:[%s3391_s1 + $0xb0] sm:$0xff] }
  0x57   : > { %2445 = vmatprep.subr.bf16.mxu0 %v2444_v63  ;;  %v2348_v61 = vpack.c.bf16 %v1626_v12, %v1625_v33 }
  0x59   : > { %2319 = vmatpush3.bf16.msra.mxu1 %v2316_v62  ;;  %v1628_v62 = vld [vmem:[%s3391_s1 + $0xc8] sm:$0xff] }
  0x5a   : > { %2447 = vmatpush3.bf16.msra.mxu0 %v2444_v63  ;;  %2321 = vmatprep.subr.bf16.mxu1 %v2320_v58  ;;  %v1691_v63 = vld [vmem:[%s3391_s1 + $0x2c0] sm:$0xff] }
  0x5b   : > { %2449 = vmatprep.subr.bf16.mxu0 %v2448_v60  ;;  %v2480_v25 = vpack.c.bf16 %v1692_v0, %v1691_v63 }
  0x5d   : > { %2323 = vmatpush3.bf16.msra.mxu1 %v2320_v58  ;;  %v2356_v58 = vpack.c.bf16 %v1630_v22, %v1629_v21 }
  0x5e   : > { %2451 = vmatpush3.bf16.msra.mxu0 %v2448_v60  ;;  %2325 = vmatprep.subr.bf16.mxu1 %v2324_v4 }
  0x5f   : > { %2453 = vmatprep.subr.bf16.mxu0 %v2452_v5 }
  0x61   : > { %2327 = vmatpush3.bf16.msra.mxu1 %v2324_v4  ;;  %v2360_v4 = vpack.c.bf16 %v1632_v36, %v1631_v1 }
  0x62   : > { %2455 = vmatpush3.bf16.msra.mxu0 %v2452_v5  ;;  %2329 = vmatprep.subr.bf16.mxu1 %v2328_v10  ;;  %v2488_v5 = vpack.c.bf16 %v1696_v3, %v1695_v2 }
  0x63   : > { %2457 = vmatprep.subr.bf16.mxu0 %v2456_v11 }
  0x65   : > { %2331 = vmatpush3.bf16.msra.mxu1 %v2328_v10  ;;  %v2364_v10 = vpack.c.bf16 %v1634_v7, %v1633_v6 }
  0x66   : > { %2459 = vmatpush3.bf16.msra.mxu0 %v2456_v11  ;;  %2333 = vmatprep.subr.bf16.mxu1 %v2332_v23  ;;  %v2492_v11 = vpack.c.bf16 %v1698_v9, %v1697_v8 }
  0x67   : > { %2461 = vmatprep.subr.bf16.mxu0 %v2460_v24 }
  0x69   : > { %2335 = vmatpush3.bf16.msra.mxu1 %v2332_v23  ;;  %v1702_v23 = vld [vmem:[%s3391_s1 + $0x418] sm:$0xff] }
  0x6a   : > { %2463 = vmatpush3.bf16.msra.mxu0 %v2460_v24  ;;  %2337 = vmatprep.subr.bf16.mxu1 %v2336_v31  ;;  %v2500_v24 = vpack.c.bf16 %v1702_v23, %v1701_v19 }
  0x6b   : > { %2465 = vmatprep.subr.bf16.mxu0 %v2464_v32 }
  0x6c   : > { %2007 = vmatmul.mubr.f32.vlgmr.msra.gmra.mrb[0].mxu1 %v2992_v47  ;;  %v2472_v47 = vpack.c.bf16 %v1688_v48, %v1687_v44 }
  0x6d   : > { %2339 = vmatpush3.bf16.msra.mxu1 %v2336_v31  ;;  %2159 = vmatmul.mubr.f32.vlgmr.msra.gmra.mrb[0].mxu0 %v1053_v40  ;;  %v1705_v31 = vld [vmem:[%s3391_s1 + $0x430] sm:$0xff] }
  0x6e   : > { %2467 = vmatpush3.bf16.msra.mxu0 %v2464_v32  ;;  %2341 = vmatprep.subr.bf16.mxu1 %v2340_v41  ;;  %v1710_v32 = vld [vmem:[%s3391_s1 + $0x458] sm:$0xff] }
  0x6f   : > { %2469 = vmatprep.subr.bf16.mxu0 %v2468_v42  ;;  %2009 = vmatprep.mubr.f32.mxu1 %v3011_v55  ;;  %v1627_v55 = vld [vmem:[%s3391_s1 + $0xc0] sm:$0xff] }
  0x70   : > { %2161 = vmatprep.mubr.f32.mxu0 %v3228_v50  ;;  %2010 = vmatmul.mubr.f32.gmra.mrb[2].mxu1 %v418_v51  ;;  %v2352_v20 = vpack.c.bf16 %v1628_v62, %v1627_v55 }
  0x71   : > { %2343 = vmatpush3.bf16.msra.mxu1 %v2340_v41  ;;  %2162 = vmatmul.mubr.f32.gmra.mrb[2].mxu0 %v3230_v53  ;;  %v1714_v41 = vld [vmem:[%s3391_s1 + $0x478] sm:$0xff] }
  0x72   : > { %2471 = vmatpush3.bf16.msra.mxu0 %v2468_v42  ;;  %2345 = vmatprep.subr.bf16.mxu1 %v2344_v52 }
  0x73   : > { %2473 = vmatprep.subr.bf16.mxu0 %v2472_v47  ;;  %2626 = vmatprep.mubr.msk.f32.mxu1 %vm2943_vm14, %v347_v26  ;;  %v1693_v26 = vld [vmem:[%s3391_s1 + $0x2d0] sm:$0xff] }
  0x74   : > { %2196 = vmatprep.mubr.f32.mxu0 %v1053_v40  ;;  %v2484_v60 = vpack.c.bf16 %v1694_v56, %v1693_v26  ;;  %v1713_v40 = vld [vmem:[%s3391_s1 + $0x470] sm:$0xff] }
  0x75   : > { %2347 = vmatpush3.bf16.msra.mxu1 %v2344_v52  ;;  %v2524_v42 = vpack.c.bf16 %v1714_v41, %v1713_v40 }
  0x76   : > { %2475 = vmatpush3.bf16.msra.mxu0 %v2472_v47  ;;  %2349 = vmatprep.subr.bf16.mxu1 %v2348_v61 }
  0x77   : > { %2477 = vmatprep.subr.bf16.mxu0 %v2476_v34 }
  0x79   : > { %2351 = vmatpush3.bf16.msra.mxu1 %v2348_v61 }
  0x7a   : > { %2479 = vmatpush3.bf16.msra.mxu0 %v2476_v34  ;;  %2353 = vmatprep.subr.bf16.mxu1 %v2352_v20 }
  0x7b   : > { %2481 = vmatprep.subr.bf16.mxu0 %v2480_v25 }
  0x7d   : > { %2355 = vmatpush3.bf16.msra.mxu1 %v2352_v20 }
  0x7e   : > { %2483 = vmatpush3.bf16.msra.mxu0 %v2480_v25  ;;  %2357 = vmatprep.subr.bf16.mxu1 %v2356_v58 }
  0x7f   : > { %2485 = vmatprep.subr.bf16.mxu0 %v2484_v60 }
  0x81   : > { %2359 = vmatpush3.bf16.msra.mxu1 %v2356_v58 }
  0x82   : > { %2487 = vmatpush3.bf16.msra.mxu0 %v2484_v60  ;;  %2361 = vmatprep.subr.bf16.mxu1 %v2360_v4 }
  0x83   : > { %2489 = vmatprep.subr.bf16.mxu0 %v2488_v5 }
  0x85   : > { %2363 = vmatpush3.bf16.msra.mxu1 %v2360_v4 }
  0x86   : > { %2491 = vmatpush3.bf16.msra.mxu0 %v2488_v5  ;;  %2365 = vmatprep.subr.bf16.mxu1 %v2364_v10 }
  0x87   : > { %2493 = vmatprep.subr.bf16.mxu0 %v2492_v11 }
  0x89   : > { %2367 = vmatpush3.bf16.msra.mxu1 %v2364_v10 }
  0x8a   : > { %2495 = vmatpush3.bf16.msra.mxu0 %v2492_v11  ;;  %2528 = vmatprep.subr.bf16.mxu1 %v2496_v16 }
  0x8b   : > { %2497 = vmatprep.subr.bf16.mxu0 %v2496_v16 }
  0x8c   : > { %2627 = vmatmul.mubr.msk.f32.vlgmr.msra.gmra.mrb[0].mxu1 %vm2850_vm4, %v2854_v46  ;;  %v2508_v46 = vpack.c.bf16 %v1706_v45, %v1705_v31 }
  0x8d   : > { %2197 = vmatmul.mubr.f32.vlgmr.msra.gmra.mrb[0].mxu0 %v3228_v50  ;;  %2536 = vmatpush3.bf16.msra.mxu1 %v2496_v16 }
  0x8e   : > { %2499 = vmatpush3.bf16.msra.mxu0 %v2496_v16  ;;  %2628 = vmatprep.mubr.msk.f32.mxu1 %vm2858_vm5, %v2871_v54  ;;  %v1708_v54 = vld [vmem:[%s3391_s1 + $0x448] sm:$0xff] }
  0x8f   : > { %2199 = vmatprep.mubr.f32.mxu0 %v3230_v53  ;;  %2501 = vmatprep.subr.bf16.mxu0 %v2500_v24  ;;  %v2512_v14 = vpack.c.bf16 %v1708_v54, %v1707_v49 }
  0x90   : > { %2629 = vmatmul.mubr.msk.f32.gmra.mrb[2].mxu1 %vm2918_vm12, %v2929_v17  ;;  %2529 = vmatprep.subr.bf16.mxu1 %v2500_v24  ;;  %v1709_v17 = vld [vmem:[%s3391_s1 + $0x450] sm:$0xff] }
  0x91   : > { %2200 = vmatmul.mubr.f32.gmra.mrb[2].mxu0 %v1056_v29  ;;  %2537 = vmatpush3.bf16.msra.mxu1 %v2500_v24  ;;  %v2516_v35 = vpack.c.bf16 %v1710_v32, %v1709_v17 }
  0x92   : > { %2503 = vmatpush3.bf16.msra.mxu0 %v2500_v24  ;;  %2530 = vmatprep.subr.bf16.mxu1 %v2504_v30 }
  0x93   : > { %2505 = vmatprep.subr.bf16.mxu0 %v2504_v30  ;;  %2234 = vmatprep.mubr.f32.mxu0 %v3228_v50 }
  0x94   : > { %2237 = vmatprep.mubr.f32.mxu1 %v1056_v29 }
  0x95   : > { %2538 = vmatpush3.bf16.msra.mxu1 %v2504_v30 }
  0x96   : > { %2507 = vmatpush3.bf16.msra.mxu0 %v2504_v30  ;;  %2531 = vmatprep.subr.bf16.mxu1 %v2508_v46 }
  0x97   : > { %2509 = vmatprep.subr.bf16.mxu0 %v2508_v46 }
  0x99   : > { %2539 = vmatpush3.bf16.msra.mxu1 %v2508_v46 }
  0x9a   : > { %2511 = vmatpush3.bf16.msra.mxu0 %v2508_v46  ;;  %2532 = vmatprep.subr.bf16.mxu1 %v2512_v14 }
  0x9b   : > { %2513 = vmatprep.subr.bf16.mxu0 %v2512_v14 }
  0x9d   : > { %2540 = vmatpush3.bf16.msra.mxu1 %v2512_v14 }
  0x9e   : > { %2515 = vmatpush3.bf16.msra.mxu0 %v2512_v14  ;;  %2533 = vmatprep.subr.bf16.mxu1 %v2516_v35 }
  0x9f   : > { %2517 = vmatprep.subr.bf16.mxu0 %v2516_v35 }
  0xa1   : > { %2541 = vmatpush3.bf16.msra.mxu1 %v2516_v35 }
  0xa2   : > { %2519 = vmatpush3.bf16.msra.mxu0 %v2516_v35  ;;  %2534 = vmatprep.subr.bf16.mxu1 %v2520_v39 }
  0xa3   : > { %2521 = vmatprep.subr.bf16.mxu0 %v2520_v39 }
  0xa5   : > { %2542 = vmatpush3.bf16.msra.mxu1 %v2520_v39 }
  0xa6   : > { %2523 = vmatpush3.bf16.msra.mxu0 %v2520_v39  ;;  %2535 = vmatprep.subr.bf16.mxu1 %v2524_v42 }
  0xa7   : > { %2525 = vmatprep.subr.bf16.mxu0 %v2524_v42 }
  0xa9   : > { %2543 = vmatpush3.bf16.msra.mxu1 %v2524_v42 }
  0xaa   : > { %2527 = vmatpush3.bf16.msra.mxu0 %v2524_v42 }
  0xac   : > { %2238 = vmatmul.mubr.f32.vlgmr.msra.gmra.mrb[4].mxu1 %v1057_v18 }
  0xad   : > { %2235 = vmatmul.mubr.f32.vlgmr.msra.gmra.mrb[0].mxu0 %v3230_v53 }
 0x15f   : > { %v2046_v43 = vpop.f32.mrb[0].mxu1 }
 0x160   : > { %v817_v44 = vpop.f32.mrb[1].mxu1 }
 0x163   : > { %v2049_v48 = vpop.f32.mrb[2].mxu1 }
 0x164   : > { %v2201_v50 = vpop.f32.mrb[2].mxu0  ;;  %v827_v51 = vpop.f32.mrb[3].mxu1 }
 0x165   : > { %v2546_v52 = vadd.f32 %v2201_v50, %v2049_v48  ;;  %v1257_v47 = vpop.f32.mrb[3].mxu0 }
 0x166   : > { %v2548_v33 = vadd.f32 %v1257_v47, %v827_v51 }
 0x17f   : > { %v2239_v12 = vpop.f32.mrb[4].mxu1 }
 0x180   : > { %v2236_v57 = vpop.f32.mrb[0].mxu0  ;;  %v2547_v53 = vadd.f32 %v2546_v52, %v2239_v12  ;;  %v1363_v59 = vpop.f32.mrb[5].mxu1 }
 0x181   : > { %v2544_v61 = vadd.f32 %v2236_v57, %v2046_v43  ;;  %v1353_v34 = vpop.f32.mrb[1].mxu0  ;;  %v2549_v55 = vadd.f32 %v2548_v33, %v1363_v59 }
 0x182   : > { %1379 = vst [vmem:[%s296_s30 + $0x18] sm:$0xff] %v2547_v53  ;;  %v2545_v62 = vadd.f32 %v1353_v34, %v817_v44  ;;  %v1393_v26 = vmul.f32 %v2547_v53, %v2547_v53 }
 0x183   : > { %1377 = vst [vmem:[%s296_s30 + $0x8] sm:$0xff] %v2544_v61  ;;  %v1391_v63 = vmul.f32 %v2544_v61, %v2544_v61  ;;  %1378 = vst [vmem:[%s296_s30 + $0x10] sm:$0xff] %v2549_v55  ;;  %v1392_v22 = vmul.f32 %v2549_v55, %v2549_v55 }
 0x184   : > { %1376 = vst [vmem:[%s296_s30] sm:$0xff] %v2545_v62  ;;  %v1380_v0 = vadd.f32 %v2545_v62, %v2544_v61  ;;  %v1390_v20 = vmul.f32 %v2545_v62, %v2545_v62 }
 0x186   : > { %v1394_v25 = vadd.f32 %v1391_v63, %v1390_v20  ;;  %v1381_v21 = vadd.f32 %v2549_v55, %v1380_v0 }
 0x188   : > { %v1382_v56 = vadd.f32 %v2547_v53, %v1381_v21  ;;  %v1395_v58 = vadd.f32 %v1394_v25, %v1392_v22 }
 0x18a   : > { %v1383_v60 = vrot.slane %v1382_v56, 4  ;;  %v1396_v1 = vadd.f32 %v1395_v58, %v1393_v26 }
 0x18c   : > { %v1384_v36 = vadd.f32 %v1383_v60, %v1382_v56  ;;  %v1397_v2 = vrot.slane %v1396_v1, 4 }
 0x18e   : > { %v1385_v3 = vrot.slane %v1384_v36, 2  ;;  %v1398_v4 = vadd.f32 %v1397_v2, %v1396_v1 }
 0x190   : > { %v1386_v5 = vadd.f32 %v1385_v3, %v1384_v36  ;;  %v1399_v6 = vrot.slane %v1398_v4, 2 }
 0x192   : > { %v1387_v7 = vrot.slane %v1386_v5, 1  ;;  %v1400_v8 = vadd.f32 %v1399_v6, %v1398_v4 }
 0x194   : > { %v1388_v9 = vadd.f32 %v1387_v7, %v1386_v5  ;;  %v1401_v10 = vrot.slane %v1400_v8, 1 }
 0x196   : > { %1389 = vst [vmem:[%s304_s11] sm:$0x1] %v1388_v9  ;;  %v1402_v11 = vadd.f32 %v1401_v10, %v1400_v8 }
 0x198   : > { %1403 = vst [vmem:[%s311_s9] sm:$0x1] %v1402_v11 }
 0x199 PF: > { %s17_s25 = sadd.s32 1, %s2668_s25   ;;  %s3409_s21 = smov %s2660_s23 }
 0x19a   : > { %p14_p8 = scmp.ge.s32.totalorder %s17_s25, 6   ;;  %s3410_s22 = smov %s2664_s24 }
 0x19b   : > { %s3411_s23 = smov %s3414_s26  ;;  %s3412_s24 = smov %s3418_s27 }
 0x19c   :  { %16 = sbr.rel (!%p14_p8) target bundleno = 3 (0x3), region = 99 }

</bundles_post_ra>
